<compile_context>
chip_gen: v7x
topology: tpu7x:2x2x1
jax: 0.10.0
libtpu: 0.0.40
codegen_flags: <defaults>
</compile_context>

<pallas_src>
import functools

import jax
import jax.numpy as jnp
from jax import lax
from jax.experimental import pallas as pl
from jax.experimental.pallas import tpu as pltpu

LRELU_ALPHA = 0.2


def _round_up(x, m):
    return (x + m - 1) // m * m


# -----------------------------------------------------------------------------
# Pallas kernel: fused 3x3 (reflect-padded) conv + LeakyReLU(0.2)
# -----------------------------------------------------------------------------
def _conv3x3_tap_kernel(*refs, stride, n_phase, cin, wo, apply_act):
    """refs = (x_{dy=0,p=0}, ..., x_{dy=2,p=n_phase-1}, w_ref, o_ref).

    x refs : (th, Wc, cin) bf16, phase-decimated rows of the padded input
    w_ref  : (9*cin, tc)   bf16, K laid out (dy, dx, cin)-major
    o_ref  : (th, Wo, tc)
    """
    x_refs = refs[:3 * n_phase]
    w_ref = refs[3 * n_phase]
    o_ref = refs[3 * n_phase + 1]
    th, _, tc = o_ref.shape

    acc = jnp.zeros((th * wo, tc), jnp.float32)
    for dy in range(3):
        for dx in range(3):
            p = dx % stride          # phase holding this tap's columns
            c0 = dx // stride        # contiguous column offset inside that phase
            xv = x_refs[dy * n_phase + p][:, c0:c0 + wo, :]           # (th, wo, cin) bf16
            wv = w_ref[(dy * 3 + dx) * cin:(dy * 3 + dx + 1) * cin, :]  # (cin, tc) bf16
            acc = acc + jnp.dot(xv.reshape(th * wo, cin), wv,
                                preferred_element_type=jnp.float32)
    if apply_act:
        acc = jnp.where(acc >= 0, acc, LRELU_ALPHA * acc)
    o_ref[...] = acc.reshape(th, wo, tc).astype(o_ref.dtype)


def conv3x3_reflect_pallas(x_nhwc, w_mat, *, stride, cin, cout,
                           apply_act=True, out_dtype=jnp.float32):
    """Conv2d(cin, cout, 3, stride, padding=1, padding_mode='reflect', bias=False)
    (+ optional LeakyReLU(0.2)) on an NHWC input, via the fused Pallas kernel.

    w_mat must come from `prepare_conv_weight` (bf16, (9*cin_pad, cout_pad))."""
    N, H, W, C = x_nhwc.shape
    assert C == cin
    s = int(stride)
    n_phase = min(s, 3)
    cin_pad = _round_up(cin, 8)
    cout_pad = w_mat.shape[1]
    assert w_mat.shape[0] == 9 * cin_pad

    Ho = (H - 1) // s + 1
    Wo = (W - 1) // s + 1
    Wc = Wo + 2                                   # columns kept per phase view

    # Reflect pad (PyTorch 'reflect'), then zero-pad channels to a sublane multiple
    # and W so every strided phase slice below stays in bounds. Cast to bf16 for the MXU.
    xp = jnp.pad(x_nhwc, ((0, 0), (1, 1), (1, 1), (0, 0)), mode="reflect")
    w_need = s * (Wc - 1) + (n_phase - 1) + 1
    pad_w = max(0, w_need - (W + 2))
    xp = jnp.pad(xp, ((0, 0), (0, 0), (0, pad_w), (0, cin_pad - cin)))
    xp = xp.astype(jnp.bfloat16)

    # ---- tile selection (conservative VMEM budget, works on v5e/v6e/v7x) ----
    NHo = N * Ho
    if cout_pad <= 256:
        tc = cout_pad
    elif cout_pad % 256 == 0:
        tc = 256
    else:
        tc = 128
    if 9 * cin_pad * tc * 2 * 2 > 12 * 1024 * 1024 and tc > 128:
        tc = 128
    th = max(1, min(NHo, -(-256 // Wo)))          # aim for ~256 matmul rows per step
    while th > 1 and th * Wc * cin_pad * 2 * (3 * n_phase) * 2 > 6 * 1024 * 1024:
        th = (th + 1) // 2
    NHo_pad = _round_up(NHo, th)

    # Phase-decimated tap views:
    #   taps[dy*n_phase + p][n*Ho + i, c, :] = xp[n, s*i + dy, s*c + p, :]
    taps = []
    for dy in range(3):
        for p in range(n_phase):
            v = lax.slice(xp, (0, dy, p, 0),
                          (N, dy + s * (Ho - 1) + 1, p + s * (Wc - 1) + 1, cin_pad),
                          (1, s, s, 1))
            v = v.reshape(NHo, Wc, cin_pad)
            if NHo_pad != NHo:
                v = jnp.pad(v, ((0, NHo_pad - NHo), (0, 0), (0, 0)))
            taps.append(v)

    grid = (NHo_pad // th, cout_pad // tc)
    x_spec = pl.BlockSpec((th, Wc, cin_pad), lambda i, j: (i, 0, 0))
    in_specs = [x_spec] * (3 * n_phase) + [
        pl.BlockSpec((9 * cin_pad, tc), lambda i, j: (0, j))]
    out_spec = pl.BlockSpec((th, Wo, tc), lambda i, j: (i, 0, j))

    kernel = functools.partial(_conv3x3_tap_kernel, stride=s, n_phase=n_phase,
                               cin=cin_pad, wo=Wo, apply_act=apply_act)
    out = pl.pallas_call(
        kernel,
        out_shape=jax.ShapeDtypeStruct((NHo_pad, Wo, cout_pad), out_dtype),
        grid_spec=pltpu.PrefetchScalarGridSpec(
            num_scalar_prefetch=0, grid=grid,
            in_specs=in_specs, out_specs=out_spec),
        compiler_params=pltpu.CompilerParams(
            dimension_semantics=("parallel", "parallel"),
            vmem_limit_bytes=32 * 1024 * 1024),
    )(*taps, w_mat)

    return out[:NHo, :, :cout].reshape(N, Ho, Wo, cout)


# -----------------------------------------------------------------------------
# Parameter preparation (spectral norm + one-time weight re-layout)
# -----------------------------------------------------------------------------
def spectral_normalize(w_oihw, key, n_iter=30):
    # TODO(synk): torch.nn.utils.spectral_norm performs ONE power iteration per forward
    # with a persistent `u`; with fixed eval-only weights we precompute a converged
    # power-iteration sigma at init instead (the value torch converges to).
    cout = w_oihw.shape[0]
    wm = w_oihw.reshape(cout, -1).astype(jnp.float32)
    u = jax.random.normal(key, (cout,), jnp.float32)
    u = u / (jnp.linalg.norm(u) + 1e-12)
    v = jnp.zeros((wm.shape[1],), jnp.float32)
    for _ in range(n_iter):
        v = wm.T @ u
        v = v / (jnp.linalg.norm(v) + 1e-12)
        u = wm @ v
        u = u / (jnp.linalg.norm(u) + 1e-12)
    sigma = u @ (wm @ v)
    return w_oihw / sigma


def prepare_conv_weight(w_oihw):
    """(O, I, 3, 3) f32 -> (9*I_pad, O_pad) bf16 with (dy, dx, cin)-major K layout,
    padded so the lane (O) dim is a multiple of 128 and the per-tap K slices are
    sublane aligned. Done once at init, not per forward."""
    cout, cin, kh, kw = w_oihw.shape
    assert (kh, kw) == (3, 3)
    cin_pad = _round_up(cin, 8)
    cout_pad = _round_up(cout, 128)
    wt = jnp.transpose(w_oihw, (2, 3, 1, 0))                        # (3, 3, cin, cout)
    wt = jnp.pad(wt, ((0, 0), (0, 0), (0, cin_pad - cin), (0, cout_pad - cout)))
    return wt.reshape(9 * cin_pad, cout_pad).astype(jnp.bfloat16)


def init_cnn_block_params(key, in_channels, out_channels, stride):
    kw, ku = jax.random.split(key)
    fan_in = float(in_channels * 9)
    w = jax.random.normal(kw, (out_channels, in_channels, 3, 3), jnp.float32)
    w = w / jnp.sqrt(fan_in)
    w_sn = spectral_normalize(w, ku)
    params = {"w_mat": prepare_conv_weight(w_sn)}
    cfg = {"cin": in_channels, "cout": out_channels, "stride": int(stride)}
    return params, cfg, w_sn


# -----------------------------------------------------------------------------
# CNNBlock forward (matches the PyTorch module): NCHW -> NCHW
# -----------------------------------------------------------------------------
def cnn_block_forward(params, x_nchw, *, cin, cout, stride, out_dtype=jnp.float32):
    x = jnp.transpose(x_nchw, (0, 2, 3, 1))               # NCHW -> NHWC
    y = conv3x3_reflect_pallas(x, params["w_mat"], stride=stride, cin=cin, cout=cout,
                               apply_act=True, out_dtype=out_dtype)
    return jnp.transpose(y, (0, 3, 1, 2))                 # NHWC -> NCHW


def reference_forward(w_oihw, x_nchw, stride):
    """Pure-JAX f32 reference of the CNNBlock forward (for correctness check)."""
    xp = jnp.pad(x_nchw, ((0, 0), (0, 0), (1, 1), (1, 1)), mode="reflect")
    y = lax.conv_general_dilated(xp, w_oihw, window_strides=(stride, stride),
                                 padding="VALID",
                                 dimension_numbers=("NCHW", "OIHW", "NCHW"))
    return jnp.where(y >= 0, y, LRELU_ALPHA * y)


if __name__ == "__main__":
    key = jax.random.PRNGKey(0)
    kp, kx = jax.random.split(key)

    in_channels, out_channels, stride = 8, 16, 2
    B, H, W = 2, 16, 16

    params, cfg, w_sn = init_cnn_block_params(kp, in_channels, out_channels, stride)
    x = jax.random.normal(kx, (B, in_channels, H, W), jnp.float32)

    fwd = jax.jit(functools.partial(cnn_block_forward, **cfg))
    out = jax.block_until_ready(fwd(params, x))

    assert out.shape == (B, out_channels, H // stride, W // stride), out.shape
    assert bool(jnp.all(jnp.isfinite(out)))

    ref = reference_forward(w_sn, x, stride)
    max_err = float(jnp.max(jnp.abs(out - ref)))
    assert max_err < 0.1, f"max abs err vs f32 reference = {max_err}"

    print("KERNEL_OK")
</pallas_src>

<mosaic_0001>
module attributes {stable_mosaic.version = 11 : i64} {
  func.func @_conv3x3_tap_kernel(%arg0: i32, %arg1: i32, %arg2: memref<16x10x8xbf16, #tpu.memory_space<vmem>>, %arg3: memref<16x10x8xbf16, #tpu.memory_space<vmem>>, %arg4: memref<16x10x8xbf16, #tpu.memory_space<vmem>>, %arg5: memref<16x10x8xbf16, #tpu.memory_space<vmem>>, %arg6: memref<16x10x8xbf16, #tpu.memory_space<vmem>>, %arg7: memref<16x10x8xbf16, #tpu.memory_space<vmem>>, %arg8: memref<72x128xbf16, #tpu.memory_space<vmem>>, %arg9: memref<16x8x128xf32, #tpu.memory_space<vmem>>) attributes {dimension_semantics = [#tpu.dimension_semantics<parallel>, #tpu.dimension_semantics<parallel>], iteration_bounds = array<i64: 1, 1>, scalar_prefetch = 0 : i64, scratch_operands = 0 : i64, tpu.core_type = #tpu.core_type<tc>, window_params = [{transform_indices = @transform_0, window_bounds = array<i64: 16, 10, 8>}, {transform_indices = @transform_1, window_bounds = array<i64: 16, 10, 8>}, {transform_indices = @transform_2, window_bounds = array<i64: 16, 10, 8>}, {transform_indices = @transform_3, window_bounds = array<i64: 16, 10, 8>}, {transform_indices = @transform_4, window_bounds = array<i64: 16, 10, 8>}, {transform_indices = @transform_5, window_bounds = array<i64: 16, 10, 8>}, {transform_indices = @transform_6, window_bounds = array<i64: 72, 128>}, {transform_indices = @transform_7, window_bounds = array<i64: 16, 8, 128>}]} {
    %cst = arith.constant 0.000000e+00 : f32
    %0 = vector.broadcast %cst : f32 to vector<128x128xf32>
    %c0 = arith.constant 0 : index
    %c0_0 = arith.constant 0 : index
    %c0_1 = arith.constant 0 : index
    %1 = vector.load %arg2[%c0, %c0_0, %c0_1] : memref<16x10x8xbf16, #tpu.memory_space<vmem>>, vector<16x8x8xbf16>
    %c0_2 = arith.constant 0 : index
    %c0_3 = arith.constant 0 : index
    %2 = vector.load %arg8[%c0_2, %c0_3] : memref<72x128xbf16, #tpu.memory_space<vmem>>, vector<8x128xbf16>
    %3 = vector.shape_cast %1 : vector<16x8x8xbf16> to vector<128x8xbf16>
    %cst_4 = arith.constant dense<0.000000e+00> : vector<128x128xf32>
    %4 = tpu.matmul %3, %2, %cst_4 {dimension_numbers = #tpu.dot_dimension_numbers<[1], [0], [0], [1], [0, 0, 1, 1], [], []>} : vector<128x8xbf16>, vector<8x128xbf16>, vector<128x128xf32> -> vector<128x128xf32>
    %5 = arith.addf %0, %4 : vector<128x128xf32>
    %c0_5 = arith.constant 0 : index
    %c0_6 = arith.constant 0 : index
    %c0_7 = arith.constant 0 : index
    %6 = vector.load %arg3[%c0_5, %c0_6, %c0_7] : memref<16x10x8xbf16, #tpu.memory_space<vmem>>, vector<16x8x8xbf16>
    %c8 = arith.constant 8 : index
    %c0_8 = arith.constant 0 : index
    %7 = vector.load %arg8[%c8, %c0_8] : memref<72x128xbf16, #tpu.memory_space<vmem>>, vector<8x128xbf16>
    %8 = vector.shape_cast %6 : vector<16x8x8xbf16> to vector<128x8xbf16>
    %cst_9 = arith.constant dense<0.000000e+00> : vector<128x128xf32>
    %9 = tpu.matmul %8, %7, %cst_9 {dimension_numbers = #tpu.dot_dimension_numbers<[1], [0], [0], [1], [0, 0, 1, 1], [], []>} : vector<128x8xbf16>, vector<8x128xbf16>, vector<128x128xf32> -> vector<128x128xf32>
    %10 = arith.addf %5, %9 : vector<128x128xf32>
    %c0_10 = arith.constant 0 : index
    %c1 = arith.constant 1 : index
    %c0_11 = arith.constant 0 : index
    %11 = vector.load %arg2[%c0_10, %c1, %c0_11] : memref<16x10x8xbf16, #tpu.memory_space<vmem>>, vector<16x8x8xbf16>
    %c16 = arith.constant 16 : index
    %c0_12 = arith.constant 0 : index
    %12 = vector.load %arg8[%c16, %c0_12] : memref<72x128xbf16, #tpu.memory_space<vmem>>, vector<8x128xbf16>
    %13 = vector.shape_cast %11 : vector<16x8x8xbf16> to vector<128x8xbf16>
    %cst_13 = arith.constant dense<0.000000e+00> : vector<128x128xf32>
    %14 = tpu.matmul %13, %12, %cst_13 {dimension_numbers = #tpu.dot_dimension_numbers<[1], [0], [0], [1], [0, 0, 1, 1], [], []>} : vector<128x8xbf16>, vector<8x128xbf16>, vector<128x128xf32> -> vector<128x128xf32>
    %15 = arith.addf %10, %14 : vector<128x128xf32>
    %c0_14 = arith.constant 0 : index
    %c0_15 = arith.constant 0 : index
    %c0_16 = arith.constant 0 : index
    %16 = vector.load %arg4[%c0_14, %c0_15, %c0_16] : memref<16x10x8xbf16, #tpu.memory_space<vmem>>, vector<16x8x8xbf16>
    %c24 = arith.constant 24 : index
    %c0_17 = arith.constant 0 : index
    %17 = vector.load %arg8[%c24, %c0_17] : memref<72x128xbf16, #tpu.memory_space<vmem>>, vector<8x128xbf16>
    %18 = vector.shape_cast %16 : vector<16x8x8xbf16> to vector<128x8xbf16>
    %cst_18 = arith.constant dense<0.000000e+00> : vector<128x128xf32>
    %19 = tpu.matmul %18, %17, %cst_18 {dimension_numbers = #tpu.dot_dimension_numbers<[1], [0], [0], [1], [0, 0, 1, 1], [], []>} : vector<128x8xbf16>, vector<8x128xbf16>, vector<128x128xf32> -> vector<128x128xf32>
    %20 = arith.addf %15, %19 : vector<128x128xf32>
    %c0_19 = arith.constant 0 : index
    %c0_20 = arith.constant 0 : index
    %c0_21 = arith.constant 0 : index
    %21 = vector.load %arg5[%c0_19, %c0_20, %c0_21] : memref<16x10x8xbf16, #tpu.memory_space<vmem>>, vector<16x8x8xbf16>
    %c32 = arith.constant 32 : index
    %c0_22 = arith.constant 0 : index
    %22 = vector.load %arg8[%c32, %c0_22] : memref<72x128xbf16, #tpu.memory_space<vmem>>, vector<8x128xbf16>
    %23 = vector.shape_cast %21 : vector<16x8x8xbf16> to vector<128x8xbf16>
    %cst_23 = arith.constant dense<0.000000e+00> : vector<128x128xf32>
    %24 = tpu.matmul %23, %22, %cst_23 {dimension_numbers = #tpu.dot_dimension_numbers<[1], [0], [0], [1], [0, 0, 1, 1], [], []>} : vector<128x8xbf16>, vector<8x128xbf16>, vector<128x128xf32> -> vector<128x128xf32>
    %25 = arith.addf %20, %24 : vector<128x128xf32>
    %c0_24 = arith.constant 0 : index
    %c1_25 = arith.constant 1 : index
    %c0_26 = arith.constant 0 : index
    %26 = vector.load %arg4[%c0_24, %c1_25, %c0_26] : memref<16x10x8xbf16, #tpu.memory_space<vmem>>, vector<16x8x8xbf16>
    %c40 = arith.constant 40 : index
    %c0_27 = arith.constant 0 : index
    %27 = vector.load %arg8[%c40, %c0_27] : memref<72x128xbf16, #tpu.memory_space<vmem>>, vector<8x128xbf16>
    %28 = vector.shape_cast %26 : vector<16x8x8xbf16> to vector<128x8xbf16>
    %cst_28 = arith.constant dense<0.000000e+00> : vector<128x128xf32>
    %29 = tpu.matmul %28, %27, %cst_28 {dimension_numbers = #tpu.dot_dimension_numbers<[1], [0], [0], [1], [0, 0, 1, 1], [], []>} : vector<128x8xbf16>, vector<8x128xbf16>, vector<128x128xf32> -> vector<128x128xf32>
    %30 = arith.addf %25, %29 : vector<128x128xf32>
    %c0_29 = arith.constant 0 : index
    %c0_30 = arith.constant 0 : index
    %c0_31 = arith.constant 0 : index
    %31 = vector.load %arg6[%c0_29, %c0_30, %c0_31] : memref<16x10x8xbf16, #tpu.memory_space<vmem>>, vector<16x8x8xbf16>
    %c48 = arith.constant 48 : index
    %c0_32 = arith.constant 0 : index
    %32 = vector.load %arg8[%c48, %c0_32] : memref<72x128xbf16, #tpu.memory_space<vmem>>, vector<8x128xbf16>
    %33 = vector.shape_cast %31 : vector<16x8x8xbf16> to vector<128x8xbf16>
    %cst_33 = arith.constant dense<0.000000e+00> : vector<128x128xf32>
    %34 = tpu.matmul %33, %32, %cst_33 {dimension_numbers = #tpu.dot_dimension_numbers<[1], [0], [0], [1], [0, 0, 1, 1], [], []>} : vector<128x8xbf16>, vector<8x128xbf16>, vector<128x128xf32> -> vector<128x128xf32>
    %35 = arith.addf %30, %34 : vector<128x128xf32>
    %c0_34 = arith.constant 0 : index
    %c0_35 = arith.constant 0 : index
    %c0_36 = arith.constant 0 : index
    %36 = vector.load %arg7[%c0_34, %c0_35, %c0_36] : memref<16x10x8xbf16, #tpu.memory_space<vmem>>, vector<16x8x8xbf16>
    %c56 = arith.constant 56 : index
    %c0_37 = arith.constant 0 : index
    %37 = vector.load %arg8[%c56, %c0_37] : memref<72x128xbf16, #tpu.memory_space<vmem>>, vector<8x128xbf16>
    %38 = vector.shape_cast %36 : vector<16x8x8xbf16> to vector<128x8xbf16>
    %cst_38 = arith.constant dense<0.000000e+00> : vector<128x128xf32>
    %39 = tpu.matmul %38, %37, %cst_38 {dimension_numbers = #tpu.dot_dimension_numbers<[1], [0], [0], [1], [0, 0, 1, 1], [], []>} : vector<128x8xbf16>, vector<8x128xbf16>, vector<128x128xf32> -> vector<128x128xf32>
    %40 = arith.addf %35, %39 : vector<128x128xf32>
    %c0_39 = arith.constant 0 : index
    %c1_40 = arith.constant 1 : index
    %c0_41 = arith.constant 0 : index
    %41 = vector.load %arg6[%c0_39, %c1_40, %c0_41] : memref<16x10x8xbf16, #tpu.memory_space<vmem>>, vector<16x8x8xbf16>
    %c64 = arith.constant 64 : index
    %c0_42 = arith.constant 0 : index
    %42 = vector.load %arg8[%c64, %c0_42] : memref<72x128xbf16, #tpu.memory_space<vmem>>, vector<8x128xbf16>
    %43 = vector.shape_cast %41 : vector<16x8x8xbf16> to vector<128x8xbf16>
    %cst_43 = arith.constant dense<0.000000e+00> : vector<128x128xf32>
    %44 = tpu.matmul %43, %42, %cst_43 {dimension_numbers = #tpu.dot_dimension_numbers<[1], [0], [0], [1], [0, 0, 1, 1], [], []>} : vector<128x8xbf16>, vector<8x128xbf16>, vector<128x128xf32> -> vector<128x128xf32>
    %45 = arith.addf %40, %44 : vector<128x128xf32>
    %cst_44 = arith.constant 0.000000e+00 : f32
    %46 = vector.broadcast %cst_44 : f32 to vector<128x128xf32>
    %47 = arith.cmpf oge, %45, %46 : vector<128x128xf32>
    %cst_45 = arith.constant 2.000000e-01 : f32
    %48 = vector.broadcast %cst_45 : f32 to vector<128x128xf32>
    %49 = arith.mulf %48, %45 : vector<128x128xf32>
    %50 = arith.select %47, %45, %49 : vector<128x128xi1>, vector<128x128xf32>
    %51 = vector.shape_cast %50 : vector<128x128xf32> to vector<16x8x128xf32>
    %c0_46 = arith.constant 0 : index
    %c0_47 = arith.constant 0 : index
    %c0_48 = arith.constant 0 : index
    %52 = vector.load %arg9[%c0_46, %c0_47, %c0_48] : memref<16x8x128xf32, #tpu.memory_space<vmem>>, vector<16x8x128xf32>
    tpu.vector_store %arg9[%c0_46, %c0_47, %c0_48], %51 {strides = array<i32>} : memref<16x8x128xf32, #tpu.memory_space<vmem>>, vector<16x8x128xf32>,
    return
  }
  func.func @transform_0(%arg0: i32, %arg1: i32) -> (i32, i32, i32) {
    %c0_i32 = arith.constant 0 : i32
    %c0_i32_0 = arith.constant 0 : i32
    %c0_i32_1 = arith.constant 0 : i32
    return %arg0, %c0_i32, %c0_i32_0 : i32, i32, i32
  }
  func.func @transform_1(%arg0: i32, %arg1: i32) -> (i32, i32, i32) {
    %c0_i32 = arith.constant 0 : i32
    %c0_i32_0 = arith.constant 0 : i32
    %c0_i32_1 = arith.constant 0 : i32
    return %arg0, %c0_i32, %c0_i32_0 : i32, i32, i32
  }
  func.func @transform_2(%arg0: i32, %arg1: i32) -> (i32, i32, i32) {
    %c0_i32 = arith.constant 0 : i32
    %c0_i32_0 = arith.constant 0 : i32
    %c0_i32_1 = arith.constant 0 : i32
    return %arg0, %c0_i32, %c0_i32_0 : i32, i32, i32
  }
  func.func @transform_3(%arg0: i32, %arg1: i32) -> (i32, i32, i32) {
    %c0_i32 = arith.constant 0 : i32
    %c0_i32_0 = arith.constant 0 : i32
    %c0_i32_1 = arith.constant 0 : i32
    return %arg0, %c0_i32, %c0_i32_0 : i32, i32, i32
  }
  func.func @transform_4(%arg0: i32, %arg1: i32) -> (i32, i32, i32) {
    %c0_i32 = arith.constant 0 : i32
    %c0_i32_0 = arith.constant 0 : i32
    %c0_i32_1 = arith.constant 0 : i32
    return %arg0, %c0_i32, %c0_i32_0 : i32, i32, i32
  }
  func.func @transform_5(%arg0: i32, %arg1: i32) -> (i32, i32, i32) {
    %c0_i32 = arith.constant 0 : i32
    %c0_i32_0 = arith.constant 0 : i32
    %c0_i32_1 = arith.constant 0 : i32
    return %arg0, %c0_i32, %c0_i32_0 : i32, i32, i32
  }
  func.func @transform_6(%arg0: i32, %arg1: i32) -> (i32, i32) {
    %c0_i32 = arith.constant 0 : i32
    %c0_i32_0 = arith.constant 0 : i32
    return %c0_i32, %arg1 : i32, i32
  }
  func.func @transform_7(%arg0: i32, %arg1: i32) -> (i32, i32, i32) {
    %c0_i32 = arith.constant 0 : i32
    %c0_i32_0 = arith.constant 0 : i32
    return %arg0, %c0_i32, %arg1 : i32, i32, i32
  }
}

</mosaic_0001>

<bundles_post_ra>
// kernel: cnn_block_forward.1
= control target key start
LH: loop header
LB: loop body
LE: loop exit
PB: predicated region body
PF: predicated region fallthrough
CT: control target
= control target key end

     0   :  { %vm127_vm0 = vcmask 1043456   ;;  %vm102_vm1 = vcmask 64512   ;;  %vm425_vm2 = vsmask.f32 3328  ;;  %vm426_vm3 = vsmask.f32 7440  ;;  %s3843_s0 = inlined_call_operand.vmem [shape: bf16[16,10,8], index: 0, kind: input, shape index: {}]   ;;  %s3844_s1 = inlined_call_operand.vmem [shape: bf16[16,10,8], index: 1, kind: input, shape index: {}]   ;;  %s3845_s2 = inlined_call_operand.vmem [shape: bf16[16,10,8], index: 2, kind: input, shape index: {}]   ;;  %s3846_s3 = inlined_call_operand.vmem [shape: bf16[16,10,8], index: 3, kind: input, shape index: {}]   ;;  %s3847_s4 = inlined_call_operand.vmem [shape: bf16[16,10,8], index: 4, kind: input, shape index: {}]   ;;  %s3848_s5 = inlined_call_operand.vmem [shape: bf16[16,10,8], index: 5, kind: input, shape index: {}]   ;;  %s3849_s6 = inlined_call_operand.vmem [shape: bf16[72,128], index: 6, kind: input, shape index: {}]   ;;  %s3850_s7 = inlined_call_operand.hbm [shape: f32[16,8,128], index: 7, kind: output, shape index: {}]  }
   0x1   :  { %v61_v0 = vld [vmem:[%s3849_s6 + $0x4] sm:$0xf]  ;;  %v3177_v1 = vld [vmem:[%s3849_s6 + $0x10] sm:$0xf]  ;;  %v3056_v4 = vld [vmem:[%s3844_s1] ss:$8 sps:$4 sm:$0xff]  }
   0x2   :  { %3043 = vmatprep.subr.msk.bf16.mxu1 %vm127_vm0, %v61_v0  ;;  %3047 = vmatprep.subr.msk.bf16.mxu0 %vm127_vm0, %v3177_v1  ;;  %v129_v2 = vsel %vm127_vm0, %v61_v0, 0  ;;  %v3185_v3 = vsel %vm127_vm0, %v3177_v1, 0  ;;  %v3057_v5 = vld [vmem:[%s3846_s3] ss:$8 sps:$4 sm:$0xff]   ;;  %v3058_v6 = vld [vmem:[%s3844_s1 + $0x10] ss:$8 sps:$4 sm:$0xff]   ;;  %vm3262_vm4 = vmor %vm425_vm2, %vm426_vm3 }
   0x3   :  { %2752 = vmatpush3.bf16.msra.mxu1 %v129_v2  ;;  %2824 = vmatpush3.bf16.msra.mxu0 %v3185_v3  ;;  %v44_v7 = vld [vmem:[%s3849_s6] sm:$0xf]  ;;  %v3059_v8 = vld [vmem:[%s3846_s3 + $0x10] ss:$8 sps:$4 sm:$0xff]   ;;  %v1242_v9 = vld [vmem:[%s3849_s6 + $0x14] sm:$0xf] }
   0x4   :  { %2753 = vmatprep.mubr.msk.bf16.mxu1 %vm102_vm1, %v3056_v4  ;;  %2825 = vmatprep.mubr.msk.bf16.mxu0 %vm102_vm1, %v3057_v5  ;;  %v293_v10 = vsel %vm127_vm0, %v44_v7, 0  ;;  %v1516_v11 = vsel %vm127_vm0, %v1242_v9, 0  ;;  %v3060_v12 = vld [vmem:[%s3844_s1 + $0x20] ss:$8 sps:$4 sm:$0xff]   ;;  %v3062_v14 = vld [vmem:[%s3844_s1 + $0x30] ss:$8 sps:$4 sm:$0xff]  }
   0x5   :  { %3044 = vmatprep.subr.msk.bf16.mxu1 %vm127_vm0, %v44_v7  ;;  %3049 = vmatprep.subr.msk.bf16.mxu0 %vm127_vm0, %v1242_v9  ;;  %v3061_v13 = vld [vmem:[%s3846_s3 + $0x20] ss:$8 sps:$4 sm:$0xff]   ;;  %v3063_v15 = vld [vmem:[%s3846_s3 + $0x30] ss:$8 sps:$4 sm:$0xff]   ;;  %v1211_v18 = vld [vmem:[%s3845_s2 + $0x4] sm:$0x1] }
   0x6   :  { %2754 = vmatmul.mubr.msk.bf16.vlgmr.msra.gmra.mrb[0].mxu1 %vm102_vm1, %v3058_v6  ;;  %2826 = vmatmul.mubr.msk.bf16.vlgmr.msra.gmra.mrb[0].mxu0 %vm102_vm1, %v3059_v8  ;;  %v3064_v16 = vld [vmem:[%s3844_s1 + $0x40] ss:$8 sps:$4 sm:$0xff]   ;;  %v1213_v20 = vld [vmem:[%s3845_s2 + $0xc] sm:$0x1]  ;;  %v1253_v23 = vshll.u32 %v1211_v18, 16 }
   0x7   :  { %2770 = vmatpush3.bf16.msra.mxu1 %v293_v10  ;;  %2842 = vmatpush3.bf16.msra.mxu0 %v1516_v11  ;;  %v1210_v17 = vld [vmem:[%s3845_s2] sm:$0xf]  ;;  %v1212_v19 = vld [vmem:[%s3845_s2 + $0x8] sm:$0xf]  ;;  %v1267_v26 = vshll.u32 %v1213_v20, 16 }
   0x8   :  { %2757 = vmatprep.mubr.msk.bf16.mxu1 %vm102_vm1, %v3060_v12  ;;  %2829 = vmatprep.mubr.msk.bf16.mxu0 %vm102_vm1, %v3061_v13  ;;  %v1244_v21 = vshrl.u32 %v1210_v17, 16  ;;  %v1247_v22 = vshll.u32 %v1210_v17, 16  ;;  %v1258_v24 = vshrl.u32 %v1212_v19, 16  ;;  %v1261_v25 = vshll.u32 %v1212_v19, 16  ;;  %v3065_v33 = vld [vmem:[%s3844_s1 + $0x50] ss:$8 sps:$4 sm:$0xff]  }
   0x9   :  { %v1255_v29 = vrot.slane %v1253_v23, 5  ;;  %v1269_v32 = vrot.slane %v1267_v26, 5  ;;  %v1214_v34 = vld [vmem:[%s3845_s2 + $0x10] sm:$0xf]  ;;  %v1215_v36 = vld [vmem:[%s3845_s2 + $0x14] sm:$0x1] }
   0xa   :  { %v1246_v27 = vrot.slane %v1244_v21, 4  ;;  %v1249_v28 = vrot.slane %v1247_v22, 5  ;;  %v1260_v30 = vrot.slane %v1258_v24, 4  ;;  %v1263_v31 = vrot.slane %v1261_v25, 5  ;;  %v1216_v37 = vld [vmem:[%s3845_s2 + $0x18] sm:$0xf] }
   0xb   :  { %v1217_v38 = vld [vmem:[%s3845_s2 + $0x1c] sm:$0x1]  ;;  %v1272_v41 = vshrl.u32 %v1214_v34, 16  ;;  %v1275_v42 = vshll.u32 %v1214_v34, 16  ;;  %v1281_v43 = vshll.u32 %v1215_v36, 16  ;;  %v1286_v46 = vshrl.u32 %v1216_v37, 16 }
   0xc   :  { %v1250_v35 = vor.u32 %v1249_v28, %v1246_v27  ;;  %v1264_v40 = vor.u32 %v1263_v31, %v1260_v30  ;;  %v1647_v44 = vld [vmem:[%s3849_s6 + $0x18] sm:$0xf]  ;;  %v1289_v47 = vshll.u32 %v1216_v37, 16  ;;  %v1295_v48 = vshll.u32 %v1217_v38, 16  ;;  %v3066_v55 = vld [vmem:[%s3844_s1 + $0x60] ss:$8 sps:$4 sm:$0xff]  }
   0xd   :  { %3050 = vmatprep.subr.msk.bf16.mxu0 %vm127_vm0, %v1647_v44  ;;  %v1274_v50 = vrot.slane %v1272_v41, 4  ;;  %v1277_v51 = vrot.slane %v1275_v42, 5  ;;  %v1288_v53 = vrot.slane %v1286_v46, 4  ;;  %v1283_v58 = vrot.slane %v1281_v43, 5  ;;  %v1218_v60 = vld [vmem:[%s3845_s2 + $0x20] sm:$0xf] }
   0xe   :  { %2758 = vmatmul.mubr.msk.bf16.gmra.mrb[4].mxu1 %vm102_vm1, %v3062_v14  ;;  %2830 = vmatmul.mubr.msk.bf16.gmra.mrb[4].mxu0 %vm102_vm1, %v3063_v15  ;;  %v1251_v45 = vrot.slane %v1250_v35, 4  ;;  %v1265_v49 = vrot.slane %v1264_v40, 4  ;;  %v1291_v54 = vrot.slane %v1289_v47, 5  ;;  %v1297_v59 = vrot.slane %v1295_v48, 5  ;;  %v1219_v61 = vld [vmem:[%s3845_s2 + $0x24] sm:$0x1] }
   0xf   :  { %2761 = vmatprep.mubr.msk.bf16.mxu1 %vm102_vm1, %v3064_v16  ;;  %v1278_v57 = vor.u32 %v1277_v51, %v1274_v50  ;;  %v1220_v0 = vld [vmem:[%s3845_s2 + $0x28] sm:$0xf]  ;;  %v1221_v2 = vld [vmem:[%s3845_s2 + $0x2c] sm:$0x1]  ;;  %v1300_v4 = vshrl.u32 %v1218_v60, 16  ;;  %v1303_v5 = vshll.u32 %v1218_v60, 16 }
  0x10   :  { %v1256_v52 = vsel %vm3262_vm4, %v1251_v45, %v1255_v29  ;;  %v1270_v56 = vsel %vm3262_vm4, %v1265_v49, %v1269_v32  ;;  %v1292_v63 = vor.u32 %v1291_v54, %v1288_v53  ;;  %v1309_v7 = vshll.u32 %v1219_v61, 16  ;;  %v3067_v18 = vld [vmem:[%s3844_s1 + $0x70] ss:$8 sps:$4 sm:$0xff]   ;;  %v1223_v24 = vld [vmem:[%s3845_s2 + $0x34] sm:$0x1] }
  0x11   :  { %v2606_v62 = vcombine.low %v1256_v52, %v1270_v56  ;;  %v1279_v6 = vrot.slane %v1278_v57, 4  ;;  %v1314_v8 = vshrl.u32 %v1220_v0, 16  ;;  %v1317_v9 = vshll.u32 %v1220_v0, 16  ;;  %v1222_v23 = vld [vmem:[%s3845_s2 + $0x30] sm:$0xf] }
  0x12   :  { %v1293_v10 = vrot.slane %v1292_v63, 4  ;;  %v1302_v11 = vrot.slane %v1300_v4, 4  ;;  %v1305_v12 = vrot.slane %v1303_v5, 5  ;;  %v1323_v13 = vshll.u32 %v1221_v2, 16  ;;  %v1224_v27 = vld [vmem:[%s3845_s2 + $0x38] sm:$0xf] }
  0x13   :  { %2843 = vmatprep.mubr.msk.bf16.mxu0 %vm102_vm1, %v2606_v62  ;;  %v1284_v14 = vsel %vm3262_vm4, %v1279_v6, %v1283_v58  ;;  %v1713_v15 = vsel %vm127_vm0, %v1647_v44, 0  ;;  %v1316_v16 = vrot.slane %v1314_v8, 4  ;;  %v1319_v17 = vrot.slane %v1317_v9, 5  ;;  %v1225_v28 = vld [vmem:[%s3845_s2 + $0x3c] sm:$0x1] }
  0x14   :  { %v1298_v19 = vsel %vm3262_vm4, %v1293_v10, %v1297_v59  ;;  %v1306_v20 = vor.u32 %v1305_v12, %v1302_v11  ;;  %v1311_v21 = vrot.slane %v1309_v7, 5  ;;  %v1325_v22 = vrot.slane %v1323_v13, 5  ;;  %v3068_v43 = vld [vmem:[%s3843_s0] ss:$8 sps:$4 sm:$0xff]   ;;  %v1227_v49 = vld [vmem:[%s3845_s2 + $0x44] sm:$0x1] }
  0x15   :  { %v2607_v25 = vcombine.low %v1284_v14, %v1298_v19  ;;  %v1320_v26 = vor.u32 %v1319_v17, %v1316_v16  ;;  %v1328_v29 = vshrl.u32 %v1222_v23, 16  ;;  %v1331_v30 = vshll.u32 %v1222_v23, 16  ;;  %v1226_v48 = vld [vmem:[%s3845_s2 + $0x40] sm:$0xf]  ;;  %v1228_v52 = vld [vmem:[%s3845_s2 + $0x48] sm:$0xf] }
  0x16   :  { %2762 = vmatmul.mubr.msk.bf16.gmra.mrb[8].mxu1 %vm102_vm1, %v3065_v33  ;;  %v1307_v31 = vrot.slane %v1306_v20, 4  ;;  %v1337_v32 = vshll.u32 %v1223_v24, 16  ;;  %v1342_v33 = vshrl.u32 %v1224_v27, 16  ;;  %v1345_v34 = vshll.u32 %v1224_v27, 16  ;;  %v1229_v53 = vld [vmem:[%s3845_s2 + $0x4c] sm:$0x1] }
  0x17   :  { %2765 = vmatprep.mubr.msk.bf16.mxu1 %vm102_vm1, %v3066_v55  ;;  %2844 = vmatmul.mubr.msk.bf16.vlgmr.msra.gmra.mrb[0].mxu0 %vm102_vm1, %v2607_v25  ;;  %v1321_v35 = vrot.slane %v1320_v26, 4  ;;  %v1330_v36 = vrot.slane %v1328_v29, 4  ;;  %v1333_v37 = vrot.slane %v1331_v30, 5  ;;  %v1351_v38 = vshll.u32 %v1225_v28, 16  ;;  %v3069_v5 = vld [vmem:[%s3843_s0 + $0x10] ss:$8 sps:$4 sm:$0xff]  }
  0x18   :  { %2860 = vmatpush3.bf16.msra.mxu0 %v1713_v15  ;;  %v1312_v40 = vsel %vm3262_vm4, %v1307_v31, %v1311_v21  ;;  %v1344_v41 = vrot.slane %v1342_v33, 4  ;;  %v1347_v42 = vrot.slane %v1345_v34, 5  ;;  %v1339_v46 = vrot.slane %v1337_v32, 5  ;;  %v424_v10 = vld [vmem:[%s3849_s6 + $0x8] sm:$0xf] }
  0x19   :  { %v1326_v44 = vsel %vm3262_vm4, %v1321_v35, %v1325_v22  ;;  %v1334_v45 = vor.u32 %v1333_v37, %v1330_v36  ;;  %v1353_v47 = vrot.slane %v1351_v38, 5  ;;  %v1356_v54 = vshrl.u32 %v1226_v48, 16  ;;  %v1230_v11 = vld [vmem:[%s3845_s2 + $0x50] sm:$0xf]  ;;  %3045 = vmatprep.subr.msk.bf16.mxu1 %vm127_vm0, %v424_v10  ;;  %v1231_v14 = vld [vmem:[%s3845_s2 + $0x54] sm:$0x1] }
  0x1a   :  { %v2608_v50 = vcombine.low %v1312_v40, %v1326_v44  ;;  %v1348_v51 = vor.u32 %v1347_v42, %v1344_v41  ;;  %v1359_v55 = vshll.u32 %v1226_v48, 16  ;;  %v1365_v57 = vshll.u32 %v1227_v49, 16  ;;  %v1232_v15 = vld [vmem:[%s3845_s2 + $0x58] sm:$0xf]  ;;  %v1233_v16 = vld [vmem:[%s3845_s2 + $0x5c] sm:$0x1] }
  0x1b   :  { %v1335_v56 = vrot.slane %v1334_v45, 4  ;;  %v1370_v58 = vshrl.u32 %v1228_v52, 16  ;;  %v1373_v59 = vshll.u32 %v1228_v52, 16  ;;  %v1358_v61 = vrot.slane %v1356_v54, 4  ;;  %v3070_v29 = vld [vmem:[%s3843_s0 + $0x20] ss:$8 sps:$4 sm:$0xff]  }
  0x1c   :  { %2847 = vmatprep.mubr.msk.bf16.mxu0 %vm102_vm1, %v2608_v50  ;;  %v1349_v60 = vrot.slane %v1348_v51, 4  ;;  %v1361_v62 = vrot.slane %v1359_v55, 5  ;;  %v1379_v63 = vshll.u32 %v1229_v53, 16  ;;  %v1367_v8 = vrot.slane %v1365_v57, 5  ;;  %v1234_v34 = vld [vmem:[%s3845_s2 + $0x60] sm:$0xf] }
  0x1d   :  { %v1340_v0 = vsel %vm3262_vm4, %v1335_v56, %v1339_v46  ;;  %v1372_v2 = vrot.slane %v1370_v58, 4  ;;  %v1375_v4 = vrot.slane %v1373_v59, 5  ;;  %v1387_v19 = vshll.u32 %v1230_v11, 16  ;;  %v1235_v38 = vld [vmem:[%s3845_s2 + $0x64] sm:$0x1] }
  0x1e   :  { %2766 = vmatmul.mubr.msk.bf16.gmra.mrb[12].mxu1 %vm102_vm1, %v3067_v18  ;;  %v1354_v6 = vsel %vm3262_vm4, %v1349_v60, %v1353_v47  ;;  %v1362_v7 = vor.u32 %v1361_v62, %v1358_v61  ;;  %v1381_v9 = vrot.slane %v1379_v63, 5  ;;  %v1384_v18 = vshrl.u32 %v1230_v11, 16  ;;  %v1236_v40 = vld [vmem:[%s3845_s2 + $0x68] sm:$0xf]  ;;  %v3071_v58 = vld [vmem:[%s3843_s0 + $0x30] ss:$8 sps:$4 sm:$0xff]  }
  0x1f   :  { %2771 = vmatprep.mubr.msk.bf16.mxu1 %vm102_vm1, %v3068_v43  ;;  %v2609_v12 = vcombine.low %v1340_v0, %v1354_v6  ;;  %v1376_v13 = vor.u32 %v1375_v4, %v1372_v2  ;;  %v1393_v20 = vshll.u32 %v1231_v14, 16  ;;  %v1398_v22 = vshrl.u32 %v1232_v15, 16  ;;  %v1237_v43 = vld [vmem:[%s3845_s2 + $0x6c] sm:$0x1]  ;;  %v1238_v59 = vld [vmem:[%s3845_s2 + $0x70] sm:$0xf] }
  0x20   :  { %v1363_v17 = vrot.slane %v1362_v7, 4  ;;  %v1401_v23 = vshll.u32 %v1232_v15, 16  ;;  %v1407_v24 = vshll.u32 %v1233_v16, 16  ;;  %v1386_v26 = vrot.slane %v1384_v18, 4  ;;  %v1239_v62 = vld [vmem:[%s3845_s2 + $0x74] sm:$0x1] }
  0x21   :  { %2848 = vmatmul.mubr.msk.bf16.gmra.mrb[4].mxu0 %vm102_vm1, %v2609_v12  ;;  %v1377_v21 = vrot.slane %v1376_v13, 4  ;;  %v1389_v27 = vrot.slane %v1387_v19, 5  ;;  %v1395_v28 = vrot.slane %v1393_v20, 5  ;;  %v1400_v31 = vrot.slane %v1398_v22, 4  ;;  %v1240_v63 = vld [vmem:[%s3845_s2 + $0x78] sm:$0xf] }
  0x22   :  { %v1368_v25 = vsel %vm3262_vm4, %v1363_v17, %v1367_v8  ;;  %v1403_v32 = vrot.slane %v1401_v23, 5  ;;  %v1409_v33 = vrot.slane %v1407_v24, 5  ;;  %v701_v37 = vsel %vm127_vm0, %v424_v10, 0  ;;  %v1241_v0 = vld [vmem:[%s3845_s2 + $0x7c] sm:$0x1] }
  0x23   :  { %v1382_v30 = vsel %vm3262_vm4, %v1377_v21, %v1381_v9  ;;  %v1390_v36 = vor.u32 %v1389_v27, %v1386_v26  ;;  %v1412_v41 = vshrl.u32 %v1234_v34, 16  ;;  %v1415_v44 = vshll.u32 %v1234_v34, 16  ;;  %v3072_v11 = vld [vmem:[%s3843_s0 + $0x40] ss:$8 sps:$4 sm:$0xff]  }
  0x24   :  { %v2610_v35 = vcombine.low %v1368_v25, %v1382_v30  ;;  %v1404_v42 = vor.u32 %v1403_v32, %v1400_v31  ;;  %v1421_v45 = vshll.u32 %v1235_v38, 16  ;;  %v1426_v46 = vshrl.u32 %v1236_v40, 16  ;;  %v3074_v25 = vld [vmem:[%s3843_s0 + $0x50] ss:$8 sps:$4 sm:$0xff]   ;;  %v3076_v30 = vld [vmem:[%s3843_s0 + $0x60] ss:$8 sps:$4 sm:$0xff]  }
  0x25   :  { %v1391_v47 = vrot.slane %v1390_v36, 4  ;;  %v1414_v48 = vrot.slane %v1412_v41, 4  ;;  %v1429_v49 = vshll.u32 %v1236_v40, 16  ;;  %v1435_v50 = vshll.u32 %v1237_v43, 16  ;;  %v3073_v32 = vld [vmem:[%s3847_s4] ss:$8 sps:$4 sm:$0xff]  }
  0x26   :  { %2772 = vmatmul.mubr.msk.bf16.vlgmr.msra.gmra.mrb[0].mxu1 %vm102_vm1, %v3069_v5  ;;  %2851 = vmatprep.mubr.msk.bf16.mxu0 %vm102_vm1, %v2610_v35  ;;  %v1405_v51 = vrot.slane %v1404_v42, 4  ;;  %v1417_v52 = vrot.slane %v1415_v44, 5  ;;  %v1423_v53 = vrot.slane %v1421_v45, 5  ;;  %v1428_v54 = vrot.slane %v1426_v46, 4  ;;  %v3078_v35 = vld [vmem:[%s3843_s0 + $0x70] ss:$8 sps:$4 sm:$0xff]  }
  0x27   :  { %2775 = vmatprep.mubr.msk.bf16.mxu1 %vm102_vm1, %v3070_v29  ;;  %2788 = vmatpush3.bf16.msra.mxu1 %v701_v37  ;;  %v1396_v55 = vsel %vm3262_vm4, %v1391_v47, %v1395_v28  ;;  %v1431_v56 = vrot.slane %v1429_v49, 5  ;;  %v1437_v57 = vrot.slane %v1435_v50, 5  ;;  %v1440_v5 = vshrl.u32 %v1238_v59, 16  ;;  %v1844_v28 = vld [vmem:[%s3849_s6 + $0x1c] sm:$0xf] }
  0x28   :  { %v1410_v60 = vsel %vm3262_vm4, %v1405_v51, %v1409_v33  ;;  %v1418_v61 = vor.u32 %v1417_v52, %v1414_v48  ;;  %v1443_v6 = vshll.u32 %v1238_v59, 16  ;;  %v1449_v8 = vshll.u32 %v1239_v62, 16  ;;  %3051 = vmatprep.subr.msk.bf16.mxu0 %vm127_vm0, %v1844_v28  ;;  %v392_v36 = vld [vmem:[%s3843_s0] sm:$0xf]  ;;  %v393_v37 = vld [vmem:[%s3843_s0 + $0x4] sm:$0x1] }
  0x29   :  { %v2611_v2 = vcombine.low %v1396_v55, %v1410_v60  ;;  %v1432_v4 = vor.u32 %v1431_v56, %v1428_v54  ;;  %v1454_v9 = vshrl.u32 %v1240_v63, 16  ;;  %v1457_v10 = vshll.u32 %v1240_v63, 16  ;;  %v394_v38 = vld [vmem:[%s3843_s0 + $0x8] sm:$0xf]  ;;  %v395_v40 = vld [vmem:[%s3843_s0 + $0xc] sm:$0x1] }
  0x2a   :  { %v1419_v7 = vrot.slane %v1418_v61, 4  ;;  %v1442_v13 = vrot.slane %v1440_v5, 4  ;;  %v1445_v14 = vrot.slane %v1443_v6, 5  ;;  %v1463_v15 = vshll.u32 %v1241_v0, 16  ;;  %v3075_v45 = vld [vmem:[%s3847_s4 + $0x10] ss:$8 sps:$4 sm:$0xff]  }
  0x2b   :  { %2852 = vmatmul.mubr.msk.bf16.gmra.mrb[8].mxu0 %vm102_vm1, %v2611_v2  ;;  %v1433_v12 = vrot.slane %v1432_v4, 4  ;;  %v1456_v17 = vrot.slane %v1454_v9, 4  ;;  %v1459_v18 = vrot.slane %v1457_v10, 5  ;;  %v1451_v21 = vrot.slane %v1449_v8, 5  ;;  %v3077_v48 = vld [vmem:[%s3847_s4 + $0x20] ss:$8 sps:$4 sm:$0xff]  }
  0x2c   :  { %v1424_v16 = vsel %vm3262_vm4, %v1419_v7, %v1423_v53  ;;  %v1446_v20 = vor.u32 %v1445_v14, %v1442_v13  ;;  %v1465_v22 = vrot.slane %v1463_v15, 5  ;;  %v1910_v34 = vsel %vm127_vm0, %v1844_v28, 0  ;;  %v396_v55 = vld [vmem:[%s3843_s0 + $0x10] sm:$0xf]  ;;  %v397_v56 = vld [vmem:[%s3843_s0 + $0x14] sm:$0x1] }
  0x2d   :  { %v1438_v19 = vsel %vm3262_vm4, %v1433_v12, %v1437_v57  ;;  %v1460_v24 = vor.u32 %v1459_v18, %v1456_v17  ;;  %v429_v41 = vshrl.u32 %v392_v36, 16  ;;  %v432_v42 = vshll.u32 %v392_v36, 16  ;;  %v399_v59 = vld [vmem:[%s3843_s0 + $0x1c] sm:$0x1]  ;;  %v832_v4 = vld [vmem:[%s3849_s6 + $0xc] sm:$0xf] }
  0x2e   :  { %2776 = vmatmul.mubr.msk.bf16.gmra.mrb[4].mxu1 %vm102_vm1, %v3071_v58  ;;  %v2612_v23 = vcombine.low %v1424_v16, %v1438_v19  ;;  %v1447_v26 = vrot.slane %v1446_v20, 4  ;;  %v438_v43 = vshll.u32 %v393_v37, 16  ;;  %v443_v44 = vshrl.u32 %v394_v38, 16  ;;  %v398_v58 = vld [vmem:[%s3843_s0 + $0x18] sm:$0xf]  ;;  %3046 = vmatprep.subr.msk.bf16.mxu1 %vm127_vm0, %v832_v4 }
  0x2f   :  { %2779 = vmatprep.mubr.msk.bf16.mxu1 %vm102_vm1, %v3072_v11  ;;  %v1461_v27 = vrot.slane %v1460_v24, 4  ;;  %v446_v46 = vshll.u32 %v394_v38, 16  ;;  %v452_v47 = vshll.u32 %v395_v40, 16  ;;  %v431_v49 = vrot.slane %v429_v41, 4  ;;  %v400_v17 = vld [vmem:[%s3843_s0 + $0x20] sm:$0xf] }
  0x30   :  { %2855 = vmatprep.mubr.msk.bf16.mxu0 %vm102_vm1, %v2612_v23  ;;  %v1452_v29 = vsel %vm3262_vm4, %v1447_v26, %v1451_v21  ;;  %v434_v50 = vrot.slane %v432_v42, 5  ;;  %v440_v51 = vrot.slane %v438_v43, 5  ;;  %v445_v52 = vrot.slane %v443_v44, 4  ;;  %v3079_v18 = vld [vmem:[%s3847_s4 + $0x30] ss:$8 sps:$4 sm:$0xff]  }
  0x31   :  { %v1466_v31 = vsel %vm3262_vm4, %v1461_v27, %v1465_v22  ;;  %v448_v53 = vrot.slane %v446_v46, 5  ;;  %v454_v54 = vrot.slane %v452_v47, 5  ;;  %v457_v60 = vshrl.u32 %v396_v55, 16  ;;  %v401_v21 = vld [vmem:[%s3843_s0 + $0x24] sm:$0x1] }
  0x32   :  { %v2613_v33 = vcombine.low %v1452_v29, %v1466_v31  ;;  %v435_v57 = vor.u32 %v434_v50, %v431_v49  ;;  %v460_v61 = vshll.u32 %v396_v55, 16  ;;  %v466_v63 = vshll.u32 %v397_v56, 16  ;;  %v402_v22 = vld [vmem:[%s3843_s0 + $0x28] sm:$0xf]  ;;  %v403_v23 = vld [vmem:[%s3843_s0 + $0x2c] sm:$0x1] }
  0x33   :  { %v449_v62 = vor.u32 %v448_v53, %v445_v52  ;;  %v471_v0 = vshrl.u32 %v398_v58, 16  ;;  %v474_v2 = vshll.u32 %v398_v58, 16  ;;  %v459_v6 = vrot.slane %v457_v60, 4  ;;  %v404_v42 = vld [vmem:[%s3843_s0 + $0x30] sm:$0xf] }
  0x34   :  { %2856 = vmatmul.mubr.msk.bf16.gmra.mrb[12].mxu0 %vm102_vm1, %v2613_v33  ;;  %v436_v5 = vrot.slane %v435_v57, 4  ;;  %v462_v7 = vrot.slane %v460_v61, 5  ;;  %v480_v8 = vshll.u32 %v399_v59, 16  ;;  %v468_v10 = vrot.slane %v466_v63, 5  ;;  %v405_v46 = vld [vmem:[%s3843_s0 + $0x34] sm:$0x1] }
  0x35   :  { %2861 = vmatprep.mubr.msk.bf16.mxu0 %vm102_vm1, %v3073_v32  ;;  %v450_v9 = vrot.slane %v449_v62, 4  ;;  %v473_v11 = vrot.slane %v471_v0, 4  ;;  %v476_v12 = vrot.slane %v474_v2, 5  ;;  %v898_v16 = vsel %vm127_vm0, %v832_v4, 0  ;;  %v3080_v32 = vld [vmem:[%s3847_s4 + $0x40] ss:$8 sps:$4 sm:$0xff]  }
  0x36   :  { %2780 = vmatmul.mubr.msk.bf16.gmra.mrb[8].mxu1 %vm102_vm1, %v3074_v25  ;;  %v441_v13 = vsel %vm3262_vm4, %v436_v5, %v440_v51  ;;  %v463_v14 = vor.u32 %v462_v7, %v459_v6  ;;  %v482_v15 = vrot.slane %v480_v8, 5  ;;  %v485_v26 = vshrl.u32 %v400_v17, 16  ;;  %v406_v47 = vld [vmem:[%s3843_s0 + $0x38] sm:$0xf]  ;;  %v407_v50 = vld [vmem:[%s3843_s0 + $0x3c] sm:$0x1] }
  0x37   :  { %2783 = vmatprep.mubr.msk.bf16.mxu1 %vm102_vm1, %v3076_v30  ;;  %v455_v19 = vsel %vm3262_vm4, %v450_v9, %v454_v54  ;;  %v477_v20 = vor.u32 %v476_v12, %v473_v11  ;;  %v488_v27 = vshll.u32 %v400_v17, 16  ;;  %v494_v29 = vshll.u32 %v401_v21, 16  ;;  %v3081_v58 = vld [vmem:[%s3847_s4 + $0x50] ss:$8 sps:$4 sm:$0xff]   ;;  %v3082_v63 = vld [vmem:[%s3847_s4 + $0x60] ss:$8 sps:$4 sm:$0xff]  }
  0x38   :  { %v2558_v24 = vcombine.low %v441_v13, %v455_v19  ;;  %v464_v25 = vrot.slane %v463_v14, 4  ;;  %v499_v30 = vshrl.u32 %v402_v22, 16  ;;  %v502_v31 = vshll.u32 %v402_v22, 16  ;;  %v408_v5 = vld [vmem:[%s3843_s0 + $0x40] sm:$0xf] }
  0x39   :  { %v478_v28 = vrot.slane %v477_v20, 4  ;;  %v508_v36 = vshll.u32 %v403_v23, 16  ;;  %v496_v38 = vrot.slane %v494_v29, 5  ;;  %v516_v51 = vshll.u32 %v404_v42, 16  ;;  %v409_v8 = vld [vmem:[%s3843_s0 + $0x44] sm:$0x1] }
  0x3a   :  { %v469_v33 = vsel %vm3262_vm4, %v464_v25, %v468_v10  ;;  %v501_v40 = vrot.slane %v499_v30, 4  ;;  %v504_v41 = vrot.slane %v502_v31, 5  ;;  %v522_v52 = vshll.u32 %v405_v46, 16  ;;  %v410_v9 = vld [vmem:[%s3843_s0 + $0x48] sm:$0xf] }
  0x3b   :  { %v483_v37 = vsel %vm3262_vm4, %v478_v28, %v482_v15  ;;  %v527_v53 = vshrl.u32 %v406_v47, 16  ;;  %v530_v56 = vshll.u32 %v406_v47, 16  ;;  %v536_v57 = vshll.u32 %v407_v50, 16  ;;  %v411_v10 = vld [vmem:[%s3843_s0 + $0x4c] sm:$0x1] }
  0x3c   :  { %2862 = vmatmul.mubr.msk.bf16.vlgmr.msra.gmra.mrb[0].mxu0 %vm102_vm1, %v3075_v45  ;;  %v2559_v43 = vcombine.low %v469_v33, %v483_v37  ;;  %v510_v45 = vrot.slane %v508_v36, 5  ;;  %v505_v49 = vor.u32 %v504_v41, %v501_v40  ;;  %v518_v60 = vrot.slane %v516_v51, 5  ;;  %v412_v22 = vld [vmem:[%s3843_s0 + $0x50] sm:$0xf]  ;;  %v414_v31 = vld [vmem:[%s3843_s0 + $0x58] sm:$0xf] }
  0x3d   :  { %2878 = vmatpush3.bf16.msra.mxu0 %v1910_v34  ;;  %2865 = vmatprep.mubr.msk.bf16.mxu0 %vm102_vm1, %v3077_v48  ;;  %v487_v34 = vrot.slane %v485_v26, 4  ;;  %v513_v48 = vshrl.u32 %v404_v42, 16  ;;  %v529_v61 = vrot.slane %v527_v53, 4  ;;  %v524_v0 = vrot.slane %v522_v52, 5  ;;  %v3084_v41 = vld [vmem:[%s3848_s5] ss:$8 sps:$4 sm:$0xff]  }
  0x3e   :  { %2784 = vmatmul.mubr.msk.bf16.gmra.mrb[12].mxu1 %vm102_vm1, %v3078_v35  ;;  %v490_v35 = vrot.slane %v488_v27, 5  ;;  %v506_v59 = vrot.slane %v505_v49, 4  ;;  %v532_v2 = vrot.slane %v530_v56, 5  ;;  %v538_v4 = vrot.slane %v536_v57, 5  ;;  %v413_v27 = vld [vmem:[%s3843_s0 + $0x54] sm:$0x1] }
  0x3f   :  { %2789 = vmatprep.mubr.msk.bf16.mxu1 %vm102_vm1, %v2558_v24  ;;  %v515_v55 = vrot.slane %v513_v48, 4  ;;  %v541_v13 = vshrl.u32 %v408_v5, 16  ;;  %v550_v15 = vshll.u32 %v409_v8, 16  ;;  %v558_v17 = vshll.u32 %v410_v9, 16  ;;  %v2057_v48 = vld [vmem:[%s3849_s6 + $0x20] sm:$0xf] }
  0x40   :  { %v491_v44 = vor.u32 %v490_v35, %v487_v34  ;;  %v511_v6 = vsel %vm3262_vm4, %v506_v59, %v510_v45  ;;  %v533_v12 = vor.u32 %v532_v2, %v529_v61  ;;  %v564_v21 = vshll.u32 %v411_v10, 16  ;;  %v3083_v35 = vld [vmem:[%s3847_s4 + $0x70] ss:$8 sps:$4 sm:$0xff]   ;;  %3052 = vmatprep.subr.msk.bf16.mxu0 %vm127_vm0, %v2057_v48  ;;  %v416_v53 = vld [vmem:[%s3843_s0 + $0x60] sm:$0xf] }
  0x41   :  { %v519_v7 = vor.u32 %v518_v60, %v515_v55  ;;  %v543_v19 = vrot.slane %v541_v13, 4  ;;  %v552_v24 = vrot.slane %v550_v15, 5  ;;  %v560_v26 = vrot.slane %v558_v17, 5  ;;  %v417_v57 = vld [vmem:[%s3843_s0 + $0x64] sm:$0x1] }
  0x42   :  { %v492_v54 = vrot.slane %v491_v44, 4  ;;  %v566_v30 = vrot.slane %v564_v21, 5  ;;  %v569_v33 = vshrl.u32 %v412_v22, 16  ;;  %v572_v37 = vshll.u32 %v412_v22, 16  ;;  %v421_v15 = vld [vmem:[%s3843_s0 + $0x74] sm:$0x1] }
  0x43   :  { %v520_v14 = vrot.slane %v519_v7, 4  ;;  %v586_v44 = vshll.u32 %v414_v31, 16  ;;  %v597_v59 = vshrl.u32 %v416_v53, 16 }
  0x44   :  { %2866 = vmatmul.mubr.msk.bf16.gmra.mrb[4].mxu0 %vm102_vm1, %v3079_v18  ;;  %v497_v62 = vsel %vm3262_vm4, %v492_v54, %v496_v38  ;;  %v534_v18 = vrot.slane %v533_v12, 4  ;;  %v578_v38 = vshll.u32 %v413_v27, 16  ;;  %v571_v42 = vrot.slane %v569_v33, 4  ;;  %v3085_v12 = vld [vmem:[%s3848_s5 + $0x10] ss:$8 sps:$4 sm:$0xff]  }
  0x45   :  { %2869 = vmatprep.mubr.msk.bf16.mxu0 %vm102_vm1, %v3080_v32  ;;  %v2560_v11 = vcombine.low %v497_v62, %v511_v6  ;;  %v525_v23 = vsel %vm3262_vm4, %v520_v14, %v524_v0  ;;  %v415_v32 = vld [vmem:[%s3843_s0 + $0x5c] sm:$0x1]  ;;  %v574_v46 = vrot.slane %v572_v37, 5  ;;  %v588_v52 = vrot.slane %v586_v44, 5  ;;  %v419_v62 = vld [vmem:[%s3843_s0 + $0x6c] sm:$0x1] }
  0x46   :  { %2790 = vmatmul.mubr.msk.bf16.vlgmr.msra.gmra.mrb[0].mxu1 %vm102_vm1, %v2559_v43  ;;  %v539_v28 = vsel %vm3262_vm4, %v534_v18, %v538_v4  ;;  %v583_v43 = vshrl.u32 %v414_v31, 16  ;;  %v592_v47 = vshll.u32 %v415_v32, 16  ;;  %v580_v50 = vrot.slane %v578_v38, 5  ;;  %v420_v14 = vld [vmem:[%s3843_s0 + $0x70] sm:$0xf] }
  0x47   :  { %2806 = vmatpush3.bf16.msra.mxu1 %v898_v16  ;;  %v555_v16 = vshrl.u32 %v410_v9, 16  ;;  %2793 = vmatprep.mubr.msk.bf16.mxu1 %vm102_vm1, %v2560_v11  ;;  %v2561_v34 = vcombine.low %v525_v23, %v539_v28  ;;  %v575_v55 = vor.u32 %v574_v46, %v571_v42  ;;  %v606_v0 = vshll.u32 %v417_v57, 16  ;;  %v3086_v27 = vld [vmem:[%s3848_s5 + $0x20] ss:$8 sps:$4 sm:$0xff]   ;;  %v3091_v57 = vld [vmem:[%s3848_s5 + $0x50] ss:$8 sps:$4 sm:$0xff]  }
  0x48   :  { %3048 = vmatprep.subr.msk.bf16.mxu1 %vm127_vm0, %v3177_v1  ;;  %v544_v1 = vshll.u32 %v408_v5, 16  ;;  %v585_v51 = vrot.slane %v583_v43, 4  ;;  %v594_v56 = vrot.slane %v592_v47, 5  ;;  %v599_v4 = vrot.slane %v597_v59, 4  ;;  %v3087_v47 = vld [vmem:[%s3848_s5 + $0x30] ss:$8 sps:$4 sm:$0xff]  }
  0x49   :  { %v557_v25 = vrot.slane %v555_v16, 4  ;;  %v576_v2 = vrot.slane %v575_v55, 4  ;;  %v608_v9 = vrot.slane %v606_v0, 5  ;;  %v620_v10 = vshll.u32 %v419_v62, 16  ;;  %v2027_v55 = vld [vmem:[%s3847_s4 + $0x8] sm:$0xf] }
  0x4a   :  { %v546_v20 = vrot.slane %v544_v1, 5  ;;  %v589_v61 = vor.u32 %v588_v52, %v585_v51  ;;  %v625_v21 = vshrl.u32 %v420_v14, 16  ;;  %v2331_v31 = vsel %vm127_vm0, %v2057_v48, 0  ;;  %v3089_v51 = vld [vmem:[%s3848_s5 + $0x40] ss:$8 sps:$4 sm:$0xff]  }
  0x4b   :  { %v561_v36 = vor.u32 %v560_v26, %v557_v25  ;;  %v581_v11 = vsel %vm3262_vm4, %v576_v2, %v580_v50  ;;  %v622_v18 = vrot.slane %v620_v10, 5  ;;  %v634_v25 = vshll.u32 %v421_v15, 16 }
  0x4c   :  { %2870 = vmatmul.mubr.msk.bf16.gmra.mrb[8].mxu0 %vm102_vm1, %v3081_v58  ;;  %v547_v29 = vor.u32 %v546_v20, %v543_v19  ;;  %v418_v58 = vld [vmem:[%s3843_s0 + $0x68] sm:$0xf]  ;;  %v590_v7 = vrot.slane %v589_v61, 4  ;;  %v422_v19 = vld [vmem:[%s3843_s0 + $0x78] sm:$0xf]  ;;  %v627_v28 = vrot.slane %v625_v21, 4 }
  0x4d   :  { %2873 = vmatprep.mubr.msk.bf16.mxu0 %vm102_vm1, %v3082_v63  ;;  %v562_v45 = vrot.slane %v561_v36, 4  ;;  %v600_v63 = vshll.u32 %v416_v53, 16  ;;  %v611_v5 = vshrl.u32 %v418_v58, 16  ;;  %v614_v6 = vshll.u32 %v418_v58, 16  ;;  %v423_v20 = vld [vmem:[%s3843_s0 + $0x7c] sm:$0x1] }
  0x4e   :  { %v548_v40 = vrot.slane %v547_v29, 4  ;;  %2794 = vmatmul.mubr.msk.bf16.gmra.mrb[4].mxu1 %vm102_vm1, %v2561_v34  ;;  %v595_v16 = vsel %vm3262_vm4, %v590_v7, %v594_v56  ;;  %v639_v29 = vshrl.u32 %v422_v19, 16  ;;  %v648_v34 = vshll.u32 %v423_v20, 16  ;;  %v2025_v53 = vld [vmem:[%s3847_s4] sm:$0xf] }
  0x4f   :  { %v567_v54 = vsel %vm3262_vm4, %v562_v45, %v566_v30  ;;  %v602_v8 = vrot.slane %v600_v63, 5  ;;  %v613_v13 = vrot.slane %v611_v5, 4  ;;  %v616_v1 = vrot.slane %v614_v6, 5  ;;  %v3090_v56 = vld [vmem:[%s3845_s2 + $0x10] ss:$8 sps:$4 sm:$0xff]  }
  0x50   :  { %v553_v49 = vsel %vm3262_vm4, %v548_v40, %v552_v24  ;;  %v2563_v22 = vcombine.low %v581_v11, %v595_v16  ;;  %v628_v24 = vshll.u32 %v420_v14, 16  ;;  %v642_v30 = vshll.u32 %v422_v19, 16  ;;  %v2028_v58 = vld [vmem:[%s3847_s4 + $0xc] sm:$0x1]  ;;  %v3092_v63 = vld [vmem:[%s3845_s2 + $0x20] ss:$8 sps:$4 sm:$0xff]  }
  0x51   :  { %v2562_v60 = vcombine.low %v553_v49, %v567_v54  ;;  %v603_v17 = vor.u32 %v602_v8, %v599_v4  ;;  %v617_v23 = vor.u32 %v616_v1, %v613_v13  ;;  %v641_v36 = vrot.slane %v639_v29, 4  ;;  %v3088_v49 = vld [vmem:[%s3845_s2] ss:$8 sps:$4 sm:$0xff]   ;;  %v2026_v54 = vld [vmem:[%s3847_s4 + $0x4] sm:$0x1] }
  0x52   :  { %v630_v33 = vrot.slane %v628_v24, 5  ;;  %v644_v37 = vrot.slane %v642_v30, 5  ;;  %v650_v44 = vrot.slane %v648_v34, 5  ;;  %v2059_v59 = vshrl.u32 %v2025_v53, 16  ;;  %v3093_v4 = vld [vmem:[%s3848_s5 + $0x60] ss:$8 sps:$4 sm:$0xff]  }
  0x53   :  { %2797 = vmatprep.mubr.msk.bf16.mxu1 %vm102_vm1, %v2562_v60  ;;  %v604_v26 = vrot.slane %v603_v17, 4  ;;  %v618_v32 = vrot.slane %v617_v23, 4  ;;  %v2062_v60 = vshll.u32 %v2025_v53, 16  ;;  %v2068_v61 = vshll.u32 %v2026_v54, 16  ;;  %v2029_v11 = vld [vmem:[%s3847_s4 + $0x10] sm:$0xf] }
  0x54   :  { %2874 = vmatmul.mubr.msk.bf16.gmra.mrb[12].mxu0 %vm102_vm1, %v3083_v35  ;;  %v631_v40 = vor.u32 %v630_v33, %v627_v28  ;;  %v645_v43 = vor.u32 %v644_v37, %v641_v36  ;;  %v2073_v62 = vshrl.u32 %v2027_v55, 16  ;;  %v2076_v0 = vshll.u32 %v2027_v55, 16  ;;  %v2031_v1 = vld [vmem:[%s3847_s4 + $0x18] sm:$0xf]  ;;  %v2032_v14 = vld [vmem:[%s3847_s4 + $0x1c] sm:$0x1] }
  0x55   :  { %2879 = vmatprep.mubr.msk.bf16.mxu0 %vm102_vm1, %v3084_v41  ;;  %v609_v35 = vsel %vm3262_vm4, %v604_v26, %v608_v9  ;;  %v623_v38 = vsel %vm3262_vm4, %v618_v32, %v622_v18  ;;  %v636_v41 = vrot.slane %v634_v25, 5  ;;  %v2082_v2 = vshll.u32 %v2028_v58, 16  ;;  %v3094_v28 = vld [vmem:[%s3845_s2 + $0x30] ss:$8 sps:$4 sm:$0xff]   ;;  %v2033_v33 = vld [vmem:[%s3847_s4 + $0x20] sm:$0xf] }
  0x56   :  { %2798 = vmatmul.mubr.msk.bf16.gmra.mrb[8].mxu1 %vm102_vm1, %v2563_v22  ;;  %v2564_v42 = vcombine.low %v609_v35, %v623_v38  ;;  %v632_v45 = vrot.slane %v631_v40, 4  ;;  %v646_v46 = vrot.slane %v645_v43, 4  ;;  %v2061_v5 = vrot.slane %v2059_v59, 4  ;;  %v3095_v29 = vld [vmem:[%s3848_s5 + $0x70] ss:$8 sps:$4 sm:$0xff]  }
  0x57   :  { %v2064_v6 = vrot.slane %v2062_v60, 5  ;;  %v2070_v7 = vrot.slane %v2068_v61, 5  ;;  %v2075_v8 = vrot.slane %v2073_v62, 4  ;;  %v2078_v9 = vrot.slane %v2076_v0, 5  ;;  %v2034_v34 = vld [vmem:[%s3847_s4 + $0x24] sm:$0x1] }
  0x58   :  { %2801 = vmatprep.mubr.msk.bf16.mxu1 %vm102_vm1, %v2564_v42  ;;  %v637_v48 = vsel %vm3262_vm4, %v632_v45, %v636_v41  ;;  %v651_v50 = vsel %vm3262_vm4, %v646_v46, %v650_v44  ;;  %v2084_v10 = vrot.slane %v2082_v2, 5  ;;  %v2087_v15 = vshrl.u32 %v2029_v11, 16  ;;  %v3096_v35 = vld [vmem:[%s3845_s2 + $0x40] ss:$8 sps:$4 sm:$0xff]   ;;  %v2036_v40 = vld [vmem:[%s3847_s4 + $0x2c] sm:$0x1] }
  0x59   :  { %v2565_v52 = vcombine.low %v637_v48, %v651_v50  ;;  %v2065_v13 = vor.u32 %v2064_v6, %v2061_v5  ;;  %v2090_v16 = vshll.u32 %v2029_v11, 16  ;;  %v2079_v17 = vor.u32 %v2078_v9, %v2075_v8  ;;  %v2035_v38 = vld [vmem:[%s3847_s4 + $0x28] sm:$0xf]  ;;  %v2039_v61 = vld [vmem:[%s3847_s4 + $0x38] sm:$0xf] }
  0x5a   :  { %v2101_v19 = vshrl.u32 %v2031_v1, 16  ;;  %v2104_v20 = vshll.u32 %v2031_v1, 16  ;;  %v2089_v22 = vrot.slane %v2087_v15, 4  ;;  %v2110_v24 = vshll.u32 %v2032_v14, 16  ;;  %v2040_v62 = vld [vmem:[%s3847_s4 + $0x3c] sm:$0x1] }
  0x5b   :  { %v2066_v21 = vrot.slane %v2065_v13, 4  ;;  %v2092_v23 = vrot.slane %v2090_v16, 5  ;;  %v2080_v25 = vrot.slane %v2079_v17, 4  ;;  %v2115_v41 = vshrl.u32 %v2033_v33, 16 }
  0x5c   :  { %2880 = vmatmul.mubr.msk.bf16.vlgmr.msra.gmra.mrb[0].mxu0 %vm102_vm1, %v3085_v12  ;;  %v2030_v12 = vld [vmem:[%s3847_s4 + $0x14] sm:$0x1]  ;;  %v2103_v26 = vrot.slane %v2101_v19, 4  ;;  %v2112_v32 = vrot.slane %v2110_v24, 5  ;;  %v2118_v42 = vshll.u32 %v2033_v33, 16  ;;  %v2124_v45 = vshll.u32 %v2034_v34, 16 }
  0x5d   :  { %2896 = vmatpush3.bf16.msra.mxu0 %v2331_v31  ;;  %2883 = vmatprep.mubr.msk.bf16.mxu0 %vm102_vm1, %v3086_v27  ;;  %v2096_v18 = vshll.u32 %v2030_v12, 16  ;;  %v2106_v27 = vrot.slane %v2104_v20, 5  ;;  %v2071_v30 = vsel %vm3262_vm4, %v2066_v21, %v2070_v7  ;;  %v2093_v31 = vor.u32 %v2092_v23, %v2089_v22  ;;  %v3098_v12 = vld [vmem:[%s3845_s2 + $0x60] ss:$8 sps:$4 sm:$0xff]   ;;  %v2042_v22 = vld [vmem:[%s3847_s4 + $0x44] sm:$0x1] }
  0x5e   :  { %2802 = vmatmul.mubr.msk.bf16.gmra.mrb[12].mxu1 %vm102_vm1, %v2565_v52  ;;  %v2085_v36 = vsel %vm3262_vm4, %v2080_v25, %v2084_v10  ;;  %v2129_v46 = vshrl.u32 %v2035_v38, 16  ;;  %v2117_v48 = vrot.slane %v2115_v41, 4  ;;  %v2132_v50 = vshll.u32 %v2035_v38, 16  ;;  %v3097_v10 = vld [vmem:[%s3845_s2 + $0x50] ss:$8 sps:$4 sm:$0xff]  }
  0x5f   :  { %2807 = vmatprep.mubr.msk.bf16.mxu1 %vm102_vm1, %v3088_v49  ;;  %v2107_v37 = vor.u32 %v2106_v27, %v2103_v26  ;;  %v2654_v43 = vcombine.low %v2071_v30, %v2085_v36  ;;  %v2094_v44 = vrot.slane %v2093_v31, 4  ;;  %v2120_v49 = vrot.slane %v2118_v42, 5  ;;  %v2041_v19 = vld [vmem:[%s3847_s4 + $0x40] sm:$0xf]  ;;  %v2043_v23 = vld [vmem:[%s3847_s4 + $0x48] sm:$0xf] }
  0x60   :  { %v2138_v52 = vshll.u32 %v2036_v40, 16  ;;  %v2126_v54 = vrot.slane %v2124_v45, 5  ;;  %v2134_v55 = vrot.slane %v2132_v50, 5  ;;  %v2157_v7 = vshrl.u32 %v2039_v61, 16  ;;  %v2044_v24 = vld [vmem:[%s3847_s4 + $0x4c] sm:$0x1] }
  0x61   :  { %v2121_v53 = vor.u32 %v2120_v49, %v2117_v48  ;;  %v2160_v8 = vshll.u32 %v2039_v61, 16  ;;  %v2166_v9 = vshll.u32 %v2040_v62, 16  ;;  %v2171_v27 = vshrl.u32 %v2041_v19, 16  ;;  %v2045_v36 = vld [vmem:[%s3847_s4 + $0x50] sm:$0xf] }
  0x62   :  { %v2140_v60 = vrot.slane %v2138_v52, 5  ;;  %v2159_v16 = vrot.slane %v2157_v7, 4  ;;  %v2180_v30 = vshll.u32 %v2042_v22, 16  ;;  %v2185_v31 = vshrl.u32 %v2043_v23, 16  ;;  %v2046_v42 = vld [vmem:[%s3847_s4 + $0x54] sm:$0x1] }
  0x63   :  { %v2122_v0 = vrot.slane %v2121_v53, 4  ;;  %v2162_v17 = vrot.slane %v2160_v8, 5  ;;  %v2173_v33 = vrot.slane %v2171_v27, 4  ;;  %v2048_v48 = vld [vmem:[%s3847_s4 + $0x5c] sm:$0x1]  ;;  %v2199_v49 = vshrl.u32 %v2045_v36, 16 }
  0x64   :  { %2884 = vmatmul.mubr.msk.bf16.gmra.mrb[4].mxu0 %vm102_vm1, %v3087_v47  ;;  %v2108_v47 = vrot.slane %v2107_v37, 4  ;;  %v2182_v38 = vrot.slane %v2180_v30, 5  ;;  %v2187_v40 = vrot.slane %v2185_v31, 4  ;;  %v2202_v52 = vshll.u32 %v2045_v36, 16 }
  0x65   :  { %2887 = vmatprep.mubr.msk.bf16.mxu0 %vm102_vm1, %v3089_v51  ;;  %v2131_v51 = vrot.slane %v2129_v46, 4  ;;  %v2127_v13 = vsel %vm3262_vm4, %v2122_v0, %v2126_v54  ;;  %v2163_v26 = vor.u32 %v2162_v17, %v2159_v16  ;;  %v2208_v53 = vshll.u32 %v2046_v42, 16  ;;  %v3100_v54 = vld [vmem:[%s3846_s3 + $0x40] ss:$8 sps:$4 sm:$0xff]  }
  0x66   :  { %2808 = vmatmul.mubr.msk.bf16.vlgmr.msra.gmra.mrb[0].mxu1 %vm102_vm1, %v3090_v56  ;;  %v2037_v56 = vld [vmem:[%s3847_s4 + $0x30] sm:$0xf]  ;;  %v2113_v59 = vsel %vm3262_vm4, %v2108_v47, %v2112_v32  ;;  %v2047_v47 = vld [vmem:[%s3847_s4 + $0x58] sm:$0xf]  ;;  %v2222_v62 = vshll.u32 %v2048_v48, 16 }
  0x67   :  { %2914 = vmatpush3.bf16.msra.mxu1 %v3185_v3  ;;  %2811 = vmatprep.mubr.msk.bf16.mxu1 %vm102_vm1, %v3092_v63  ;;  %v2098_v3 = vrot.slane %v2096_v18, 5  ;;  %v2143_v63 = vshrl.u32 %v2037_v56, 16  ;;  %v2135_v2 = vor.u32 %v2134_v55, %v2131_v51  ;;  %v2168_v18 = vrot.slane %v2166_v9, 5 }
  0x68   :  { %v2164_v32 = vrot.slane %v2163_v26, 4  ;;  %v2210_v61 = vrot.slane %v2208_v53, 5  ;;  %v2224_v9 = vrot.slane %v2222_v62, 5 }
  0x69   :  { %v2099_v58 = vsel %vm3262_vm4, %v2094_v44, %v2098_v3  ;;  %v2145_v6 = vrot.slane %v2143_v63, 4  ;;  %v2136_v1 = vrot.slane %v2135_v2, 4  ;;  %v2188_v3 = vshll.u32 %v2043_v23, 16  ;;  %v2049_v63 = vld [vmem:[%s3847_s4 + $0x60] sm:$0xf] }
  0x6a   :  { %v2655_v11 = vcombine.low %v2099_v58, %v2113_v59  ;;  %v2169_v44 = vsel %vm3262_vm4, %v2164_v32, %v2168_v18  ;;  %v2216_v58 = vshll.u32 %v2047_v47, 16  ;;  %v2056_v32 = vld [vmem:[%s3847_s4 + $0x7c] sm:$0x1] }
  0x6b   :  { %v2141_v20 = vsel %vm3262_vm4, %v2136_v1, %v2140_v60  ;;  %v2190_v41 = vrot.slane %v2188_v3, 5  ;;  %v2204_v60 = vrot.slane %v2202_v52, 5  ;;  %v2230_v1 = vshll.u32 %v2049_v63, 16 }
  0x6c   :  { %2888 = vmatmul.mubr.msk.bf16.gmra.mrb[8].mxu0 %vm102_vm1, %v3091_v57  ;;  %v2038_v57 = vld [vmem:[%s3847_s4 + $0x34] sm:$0x1]  ;;  %v2656_v25 = vcombine.low %v2127_v13, %v2141_v20  ;;  %v3101_v20 = vld [vmem:[%s3846_s3 + $0x50] ss:$8 sps:$4 sm:$0xff]  }
  0x6d   :  { %2891 = vmatprep.mubr.msk.bf16.mxu0 %vm102_vm1, %v3093_v4  ;;  %v2146_v4 = vshll.u32 %v2037_v56, 16  ;;  %v2152_v5 = vshll.u32 %v2038_v57, 16  ;;  %v2191_v51 = vor.u32 %v2190_v41, %v2187_v40  ;;  %v2201_v56 = vrot.slane %v2199_v49, 4 }
  0x6e   :  { %2812 = vmatmul.mubr.msk.bf16.gmra.mrb[4].mxu1 %vm102_vm1, %v3094_v28  ;;  %v2174_v28 = vshll.u32 %v2041_v19, 16  ;;  %v2213_v57 = vshrl.u32 %v2047_v47, 16  ;;  %v2053_v19 = vld [vmem:[%s3847_s4 + $0x70] sm:$0xf]  ;;  %v2232_v22 = vrot.slane %v2230_v1, 5 }
  0x6f   :  { %2815 = vmatprep.mubr.msk.bf16.mxu1 %vm102_vm1, %v3096_v35  ;;  %v2148_v14 = vrot.slane %v2146_v4, 5  ;;  %v2154_v15 = vrot.slane %v2152_v5, 5  ;;  %v2194_v35 = vshll.u32 %v2044_v24, 16  ;;  %v2192_v59 = vrot.slane %v2191_v51, 4  ;;  %v2050_v5 = vld [vmem:[%s3847_s4 + $0x64] sm:$0x1] }
  0x70   :  { %v2176_v34 = vrot.slane %v2174_v28, 5  ;;  %v2215_v2 = vrot.slane %v2213_v57, 4  ;;  %v2218_v4 = vrot.slane %v2216_v58, 5  ;;  %v2205_v8 = vor.u32 %v2204_v60, %v2201_v56  ;;  %v2054_v24 = vld [vmem:[%s3847_s4 + $0x74] sm:$0x1] }
  0x71   :  { %v2149_v21 = vor.u32 %v2148_v14, %v2145_v6  ;;  %v2196_v46 = vrot.slane %v2194_v35, 5  ;;  %v2051_v6 = vld [vmem:[%s3847_s4 + $0x68] sm:$0xf]  ;;  %v2236_v14 = vshll.u32 %v2050_v5, 16 }
  0x72   :  { %v2177_v45 = vor.u32 %v2176_v34, %v2173_v33  ;;  %v2219_v13 = vor.u32 %v2218_v4, %v2215_v2  ;;  %v2241_v17 = vshrl.u32 %v2051_v6, 16  ;;  %v2244_v18 = vshll.u32 %v2051_v6, 16 }
  0x73   :  { %v2197_v7 = vsel %vm3262_vm4, %v2192_v59, %v2196_v46  ;;  %v2238_v26 = vrot.slane %v2236_v14, 5  ;;  %v2255_v33 = vshrl.u32 %v2053_v19, 16 }
  0x74   :  { %2892 = vmatmul.mubr.msk.bf16.gmra.mrb[12].mxu0 %vm102_vm1, %v3095_v29  ;;  %v2150_v29 = vrot.slane %v2149_v21, 4  ;;  %v2178_v55 = vrot.slane %v2177_v45, 4  ;;  %v2220_v21 = vrot.slane %v2219_v13, 4  ;;  %v2243_v27 = vrot.slane %v2241_v17, 4 }
  0x75   :  { %2897 = vmatprep.mubr.msk.bf16.mxu0 %vm102_vm1, %v2654_v43  ;;  %v3099_v43 = vld [vmem:[%s3845_s2 + $0x70] ss:$8 sps:$4 sm:$0xff]   ;;  %v2246_v28 = vrot.slane %v2244_v18, 5 }
  0x76   :  { %2816 = vmatmul.mubr.msk.bf16.gmra.mrb[8].mxu1 %vm102_vm1, %v3097_v10  ;;  %v2155_v37 = vsel %vm3262_vm4, %v2150_v29, %v2154_v15  ;;  %v2183_v0 = vsel %vm3262_vm4, %v2178_v55, %v2182_v38  ;;  %v2052_v10 = vld [vmem:[%s3847_s4 + $0x6c] sm:$0x1]  ;;  %v2206_v15 = vrot.slane %v2205_v8, 4  ;;  %v2055_v29 = vld [vmem:[%s3847_s4 + $0x78] sm:$0xf]  ;;  %v2225_v30 = vsel %vm3262_vm4, %v2220_v21, %v2224_v9 }
  0x77   :  { %2819 = vmatprep.mubr.msk.bf16.mxu1 %vm102_vm1, %v3098_v12  ;;  %v2657_v50 = vcombine.low %v2155_v37, %v2169_v44  ;;  %v2658_v12 = vcombine.low %v2183_v0, %v2197_v7  ;;  %v2250_v23 = vshll.u32 %v2052_v10, 16 }
  0x79   :  { %v2252_v3 = vrot.slane %v2250_v23, 5 }
  0x7c   :  { %2898 = vmatmul.mubr.msk.bf16.vlgmr.msra.gmra.mrb[0].mxu0 %vm102_vm1, %v2655_v11  ;;  %v2227_v11 = vshrl.u32 %v2049_v63, 16 }
  0x7d   :  { %2901 = vmatprep.mubr.msk.bf16.mxu0 %vm102_vm1, %v2656_v25  ;;  %v2211_v25 = vsel %vm3262_vm4, %v2206_v15, %v2210_v61 }
  0x7e   :  { %2820 = vmatmul.mubr.msk.bf16.gmra.mrb[12].mxu1 %vm102_vm1, %v3099_v43  ;;  %v2229_v16 = vrot.slane %v2227_v11, 4 }
  0x7f   :  { %2833 = vmatprep.mubr.msk.bf16.mxu1 %vm102_vm1, %v3100_v54 }
  0x80   :  { %v2233_v31 = vor.u32 %v2232_v22, %v2229_v16 }
  0x84   :  { %2902 = vmatmul.mubr.msk.bf16.gmra.mrb[4].mxu0 %vm102_vm1, %v2657_v50 }
  0x85   :  { %2905 = vmatprep.mubr.msk.bf16.mxu0 %vm102_vm1, %v2658_v12 }
  0x86   :  { %12 = vsyncpa [#allocation3], 0  ;;  %v2659_v34 = vcombine.low %v2211_v25, %v2225_v30  ;;  %v3102_v35 = vld [vmem:[%s3846_s3 + $0x60] ss:$8 sps:$4 sm:$0xff]   ;;  %v2247_v36 = vor.u32 %v2246_v28, %v2243_v27  ;;  %v2258_v37 = vshll.u32 %v2053_v19, 16  ;;  %v2264_v38 = vshll.u32 %v2054_v24, 16  ;;  %2834 = vmatmul.mubr.msk.bf16.vlgmr.msra.gmra.mrb[8].mxu1 %vm102_vm1, %v3101_v20 }
  0x87   :  { %v2234_v40 = vrot.slane %v2233_v31, 4  ;;  %v2257_v41 = vrot.slane %v2255_v33, 4  ;;  %v2269_v42 = vshrl.u32 %v2055_v29, 16  ;;  %v2272_v43 = vshll.u32 %v2055_v29, 16  ;;  %2837 = vmatprep.mubr.msk.bf16.mxu1 %vm102_vm1, %v3102_v35  ;;  %v3103_v57 = vld [vmem:[%s3846_s3 + $0x70] ss:$8 sps:$4 sm:$0xff]  }
  0x88   :  { %v2248_v44 = vrot.slane %v2247_v36, 4  ;;  %v2260_v45 = vrot.slane %v2258_v37, 5  ;;  %v2278_v46 = vshll.u32 %v2056_v32, 16  ;;  %v2266_v52 = vrot.slane %v2264_v38, 5  ;;  %s3128_s3 = smov [#allocation2]  }
  0x89   :  { %v2239_v47 = vsel %vm3262_vm4, %v2234_v40, %v2238_v26  ;;  %v2271_v48 = vrot.slane %v2269_v42, 4  ;;  %v2274_v49 = vrot.slane %v2272_v43, 5  ;;  %s2515_s30 = sshll.u32 %s3128_s3, 4  ;;  %s2516_s30 = int_to_ptr.vmem [resolvable:$true] %s2515_s30 }
  0x8a   :  { %v2253_v50 = vsel %vm3262_vm4, %v2248_v44, %v2252_v3  ;;  %v2261_v51 = vor.u32 %v2260_v45, %v2257_v41  ;;  %v2280_v55 = vrot.slane %v2278_v46, 5  ;;  %s3104_s8 = scalar_lea.vmem %s2516_s30, 2048  ;;  %p3109_p1 = scmp.lt.s32.totalorder %s2516_s30, %s2516_s30 }
  0x8b   :  { %v2660_v53 = vcombine.low %v2239_v47, %v2253_v50  ;;  %v2275_v54 = vor.u32 %v2274_v49, %v2271_v48  ;;  %p3105_p0 = scmp.ne.s32.totalorder %s2516_s30, %s3104_s8  ;;  %p3110_p2 = scmp.lt.s32.totalorder %s3104_s8, %s3104_s8 }
  0x8c   :  { %2906 = vmatmul.mubr.msk.bf16.gmra.mrb[8].mxu0 %vm102_vm1, %v2659_v34  ;;  %v2262_v56 = vrot.slane %v2261_v51, 4 }
  0x8d   :  { %2909 = vmatprep.mubr.msk.bf16.mxu0 %vm102_vm1, %v2660_v53  ;;  %v2276_v58 = vrot.slane %v2275_v54, 4  ;;  %p3111_p3 = por %p3110_p2, %p3109_p1 }
  0x8e   :  { %v2267_v59 = vsel %vm3262_vm4, %v2262_v56, %v2266_v52  ;;  %2838 = vmatmul.mubr.msk.bf16.gmra.mrb[12].mxu1 %vm102_vm1, %v3103_v57 }
  0x8f   :  { %v2281_v60 = vsel %vm3262_vm4, %v2276_v58, %v2280_v55  ;;  %p3112_p4 = pnand %p3111_p3, %p3105_p0 }
  0x90   :  { %v2661_v61 = vcombine.low %v2267_v59, %v2281_v60 }
  0x94   :  { %2910 = vmatmul.mubr.msk.bf16.gmra.mrb[12].mxu0 %vm102_vm1, %v2661_v61 }
 0x139   :  { %v2809_v62 = vpop.f32.mrb[0].mxu1 }
 0x13a   :  { %v934_v63 = vpop.f32.mrb[1].mxu1 }
 0x13b   :  { %v2810_v0 = vpop.f32.mrb[2].mxu1 }
 0x13c   :  { %v937_v2 = vpop.f32.mrb[3].mxu1 }
 0x141   :  { %v2813_v4 = vpop.f32.mrb[4].mxu1 }
 0x142   :  { %v950_v5 = vpop.f32.mrb[5].mxu1 }
 0x143   :  { %v2814_v6 = vpop.f32.mrb[6].mxu1 }
 0x144   :  { %v953_v7 = vpop.f32.mrb[7].mxu1 }
 0x14f   :  { %v2899_v8 = vpop.f32.mrb[0].mxu0 }
 0x150   :  { %v2915_v9 = vadd.f32 %v2899_v8, %v2809_v62  ;;  %v2367_v10 = vpop.f32.mrb[1].mxu0 }
 0x151   :  { %v2916_v11 = vadd.f32 %v2367_v10, %v934_v63  ;;  %v2900_v12 = vpop.f32.mrb[2].mxu0 }
 0x152   :  { %vm2448_vm5 = vcmp.ge.f32.partialorder %v2915_v9, 0.0  ;;  %v2464_v39 = vmul.f32 0.2, %v2915_v9  ;;  %v2917_v13 = vadd.f32 %v2900_v12, %v2810_v0  ;;  %v2370_v1 = vpop.f32.mrb[3].mxu0 }
 0x153   :  { %vm2446_vm6 = vcmp.ge.f32.partialorder %v2916_v11, 0.0  ;;  %v2462_v14 = vmul.f32 0.2, %v2916_v11  ;;  %v2918_v15 = vadd.f32 %v2370_v1, %v937_v2 }
 0x154   :  { %v2480_v16 = vsel %vm2448_vm5, %v2915_v9, %v2464_v39  ;;  %vm2449_vm7 = vcmp.ge.f32.partialorder %v2917_v13, 0.0  ;;  %v2465_v17 = vmul.f32 0.2, %v2917_v13 }
 0x155   :  { %2496 = vst [vmem:[#allocation2 + $0x10] sm:$0xff] %v2480_v16  ;;  %v2478_v18 = vsel %vm2446_vm6, %v2916_v11, %v2462_v14  ;;  %vm2447_vm8 = vcmp.ge.f32.partialorder %v2918_v15, 0.0  ;;  %v2463_v19 = vmul.f32 0.2, %v2918_v15 }
 0x156   :  { %2494 = vst [vmem:[#allocation2] sm:$0xff] %v2478_v18  ;;  %v2481_v20 = vsel %vm2449_vm7, %v2917_v13, %v2465_v17 }
 0x157   :  { %2497 = vst [vmem:[#allocation2 + $0x18] sm:$0xff] %v2481_v20  ;;  %v2479_v21 = vsel %vm2447_vm8, %v2918_v15, %v2463_v19  ;;  %v2903_v22 = vpop.f32.mrb[4].mxu0 }
 0x158   :  { %2495 = vst [vmem:[#allocation2 + $0x8] sm:$0xff] %v2479_v21  ;;  %v2919_v23 = vadd.f32 %v2903_v22, %v2813_v4  ;;  %v2383_v24 = vpop.f32.mrb[5].mxu0 }
 0x159   :  { %v2920_v25 = vadd.f32 %v2383_v24, %v950_v5  ;;  %v2904_v26 = vpop.f32.mrb[6].mxu0  ;;  %v2835_v37 = vpop.f32.mrb[8].mxu1 }
 0x15a   :  { %vm2452_vm9 = vcmp.ge.f32.partialorder %v2919_v23, 0.0  ;;  %v2468_v27 = vmul.f32 0.2, %v2919_v23  ;;  %v2921_v28 = vadd.f32 %v2904_v26, %v2814_v6  ;;  %v2386_v29 = vpop.f32.mrb[7].mxu0  ;;  %v1163_v41 = vpop.f32.mrb[9].mxu1 }
 0x15b   :  { %vm2450_vm10 = vcmp.ge.f32.partialorder %v2920_v25, 0.0  ;;  %v2466_v30 = vmul.f32 0.2, %v2920_v25  ;;  %v2922_v31 = vadd.f32 %v2386_v29, %v953_v7  ;;  %v2836_v44 = vpop.f32.mrb[10].mxu1 }
 0x15c   :  { %v2484_v3 = vsel %vm2452_vm9, %v2919_v23, %v2468_v27  ;;  %vm2453_vm11 = vcmp.ge.f32.partialorder %v2921_v28, 0.0  ;;  %v2469_v32 = vmul.f32 0.2, %v2921_v28  ;;  %v1166_v48 = vpop.f32.mrb[11].mxu1 }
 0x15d   :  { %2500 = vst [vmem:[#allocation2 + $0x30] sm:$0xff] %v2484_v3  ;;  %v2482_v33 = vsel %vm2450_vm10, %v2920_v25, %v2466_v30  ;;  %vm2451_vm12 = vcmp.ge.f32.partialorder %v2922_v31, 0.0  ;;  %v2467_v34 = vmul.f32 0.2, %v2922_v31 }
 0x15e   :  { %2498 = vst [vmem:[#allocation2 + $0x20] sm:$0xff] %v2482_v33  ;;  %v2485_v35 = vsel %vm2453_vm11, %v2921_v28, %v2469_v32 }
 0x15f   :  { %2501 = vst [vmem:[#allocation2 + $0x38] sm:$0xff] %v2485_v35  ;;  %v2483_v36 = vsel %vm2451_vm12, %v2922_v31, %v2467_v34  ;;  %v2907_v38 = vpop.f32.mrb[8].mxu0 }
 0x160   :  { %2499 = vst [vmem:[#allocation2 + $0x28] sm:$0xff] %v2483_v36  ;;  %v2923_v40 = vadd.f32 %v2907_v38, %v2835_v37  ;;  %v2399_v42 = vpop.f32.mrb[9].mxu0 }
 0x161   :  { %v2924_v43 = vadd.f32 %v2399_v42, %v1163_v41  ;;  %v2908_v45 = vpop.f32.mrb[10].mxu0  ;;  %v2839_v58 = vpop.f32.mrb[12].mxu1 }
 0x162   :  { %vm2456_vm13 = vcmp.ge.f32.partialorder %v2923_v40, 0.0  ;;  %v2472_v46 = vmul.f32 0.2, %v2923_v40  ;;  %v2925_v47 = vadd.f32 %v2908_v45, %v2836_v44  ;;  %v2402_v49 = vpop.f32.mrb[11].mxu0  ;;  %v1179_v60 = vpop.f32.mrb[13].mxu1 }
 0x163   :  { %vm2454_vm14 = vcmp.ge.f32.partialorder %v2924_v43, 0.0  ;;  %v2470_v50 = vmul.f32 0.2, %v2924_v43  ;;  %v2926_v51 = vadd.f32 %v2402_v49, %v1166_v48  ;;  %v2840_v63 = vpop.f32.mrb[14].mxu1 }
 0x164   :  { %v2488_v52 = vsel %vm2456_vm13, %v2923_v40, %v2472_v46  ;;  %vm2457_vm15 = vcmp.ge.f32.partialorder %v2925_v47, 0.0  ;;  %v2473_v53 = vmul.f32 0.2, %v2925_v47  ;;  %v1182_v4 = vpop.f32.mrb[15].mxu1 }
 0x165   :  { %2504 = vst [vmem:[#allocation2 + $0x50] sm:$0xff] %v2488_v52  ;;  %v2486_v54 = vsel %vm2454_vm14, %v2924_v43, %v2470_v50  ;;  %vm2455_vm0 = vcmp.ge.f32.partialorder %v2926_v51, 0.0  ;;  %v2471_v55 = vmul.f32 0.2, %v2926_v51 }
 0x166   :  { %2502 = vst [vmem:[#allocation2 + $0x40] sm:$0xff] %v2486_v54  ;;  %v2489_v56 = vsel %vm2457_vm15, %v2925_v47, %v2473_v53 }
 0x167   :  { %2505 = vst [vmem:[#allocation2 + $0x58] sm:$0xff] %v2489_v56  ;;  %v2487_v57 = vsel %vm2455_vm0, %v2926_v51, %v2471_v55  ;;  %v2911_v59 = vpop.f32.mrb[12].mxu0 }
 0x168   :  { %2503 = vst [vmem:[#allocation2 + $0x48] sm:$0xff] %v2487_v57  ;;  %v2927_v61 = vadd.f32 %v2911_v59, %v2839_v58  ;;  %v2415_v62 = vpop.f32.mrb[13].mxu0 }
 0x169   :  { %v2928_v0 = vadd.f32 %v2415_v62, %v1179_v60  ;;  %v2912_v2 = vpop.f32.mrb[14].mxu0 }
 0x16a   :  { %vm2460_vm1 = vcmp.ge.f32.partialorder %v2927_v61, 0.0  ;;  %v2476_v5 = vmul.f32 0.2, %v2927_v61  ;;  %v2929_v6 = vadd.f32 %v2912_v2, %v2840_v63  ;;  %v2418_v7 = vpop.f32.mrb[15].mxu0 }
 0x16b   :  { %vm2458_vm2 = vcmp.ge.f32.partialorder %v2928_v0, 0.0  ;;  %v2474_v8 = vmul.f32 0.2, %v2928_v0  ;;  %v2930_v9 = vadd.f32 %v2418_v7, %v1182_v4 }
 0x16c   :  { %v2492_v10 = vsel %vm2460_vm1, %v2927_v61, %v2476_v5  ;;  %vm2461_vm3 = vcmp.ge.f32.partialorder %v2929_v6, 0.0  ;;  %v2477_v11 = vmul.f32 0.2, %v2929_v6 }
 0x16d   :  { %2508 = vst [vmem:[#allocation2 + $0x70] sm:$0xff] %v2492_v10  ;;  %v2490_v12 = vsel %vm2458_vm2, %v2928_v0, %v2474_v8  ;;  %vm2459_vm4 = vcmp.ge.f32.partialorder %v2930_v9, 0.0  ;;  %v2475_v39 = vmul.f32 0.2, %v2930_v9 }
 0x16e   :  { %2506 = vst [vmem:[#allocation2 + $0x60] sm:$0xff] %v2490_v12  ;;  %v2493_v13 = vsel %vm2461_vm3, %v2929_v6, %v2477_v11 }
 0x16f   :  { %2509 = vst [vmem:[#allocation2 + $0x78] sm:$0xff] %v2493_v13  ;;  %v2491_v1 = vsel %vm2459_vm4, %v2930_v9, %v2475_v39 }
 0x170   :  { %2507 = vst [vmem:[#allocation2 + $0x68] sm:$0xff] %v2491_v1 }
 0x171   :  { %3115 = shalt.err (!%p3112_p4)
}
 0x172   :  { %s3116_s11 = scalar_lea.hbm %s3850_s7, 2048 }
 0x173   :  { %p3117_p5 = scmp.ne.s32.totalorder %s3850_s7, %s3116_s11  ;;  %p3120_p6 = scmp.lt.u32.totalorder %s3116_s11, %s3850_s7 }
 0x175   :  { %p3122_p7 = pnand %p3120_p6, %p3117_p5 }
 0x177   :  { %3125 = shalt.err (!%p3122_p7)
}
 0x178   :  { %s3129_s15 = smov 128   ;;  %s3130_s16 = smov 8  }
 0x179   :  { %2521 = dma.vmem_to_hbm [thread:$0]  %s2516_s30, 2048, %s3850_s7, [#allocation3], %s3129_s15, %s3129_s15, %s3130_s16  }
 0x17a   :  { %3126 = dma.done.wait [#allocation3], 2048  }
 0x17b   :  { %3127 = vsyncadd [#allocation3], 4294965248 }
 0x17c   :  { %2525 = vsyncpa [#allocation3], 1 }

</bundles_post_ra>
